<compile_context>
chip_gen: v5e
topology: v5e:2x2
jax: 0.10.0
libtpu: 0.0.40
codegen_flags: <defaults>
</compile_context>

<pallas_src>
import jax
import jax.numpy as jnp
from jax.experimental import pallas as pl
from jax.experimental.pallas import tpu as pltpu


# ---------------- fused direct-conv + BN-statistics Pallas kernel ----------------

def _make_conv_kernel(offsets, Ho, Wo, fuse_in_bn, rebuild_every_step):
    """Direct conv as one wide-K MXU matmul against an in-VMEM im2col scratch.
    The scratch (and the optional fused BN+ReLU of the previous layer) is built
    only when the resident activation block changes. Emits per-block BN partial
    sums (sum, sum-of-squares) alongside the conv output."""
    M = Ho * Wo

    def kernel(*refs):
        if fuse_in_bn:
            x_ref, w_ref, sc_ref, sh_ref, y_ref, s_ref, ss_ref, patch_ref = refs
        else:
            x_ref, w_ref, y_ref, s_ref, ss_ref, patch_ref = refs
        Cs = x_ref.shape[-1]

        def build_patches():
            xv = x_ref[0]                                    # (Hps, Wps, Cs) f32
            if fuse_in_bn:
                Hps, Wps = xv.shape[0], xv.shape[1]
                t = jnp.maximum(xv * sc_ref[...] + sh_ref[...], 0.0)
                # Regenerate the zero padding ring in-kernel (relu(shift) != 0
                # on the border otherwise) -- pure VPU, no mask DMA.
                row = jax.lax.broadcasted_iota(jnp.int32, (Hps, Wps, Cs), 0)
                col = jax.lax.broadcasted_iota(jnp.int32, (Hps, Wps, Cs), 1)
                interior = ((row >= 1) & (row <= Hps - 2) &
                            (col >= 1) & (col <= Wps - 2))
                xv = jnp.where(interior, t, 0.0)
            xv = xv.astype(patch_ref.dtype)                  # bf16 MXU operand
            cols = [xv[qi:qi + Ho, qj:qj + Wo, :].reshape(M, Cs)
                    for (qi, qj) in offsets]
            patch_ref[...] = jnp.concatenate(cols, axis=1)   # (M, G*Cs)

        if rebuild_every_step:
            build_patches()
        else:
            # The activation block is resident across the inner (Cout-tile)
            # axis: build the im2col (+ fused BN/ReLU) once and reuse it.
            pl.when(pl.program_id(1) == 0)(build_patches)

        w = w_ref[...]
        tn = w.shape[-1]
        if M <= 512:
            # Single MXU matmul; accumulation stays inside the MXU in f32.
            acc = jnp.dot(patch_ref[...], w, preferred_element_type=jnp.float32)
            y_ref[0] = acc
            s_ref[0] = jnp.sum(acc, axis=0, keepdims=True)
            ss_ref[0] = jnp.sum(acc * acc, axis=0, keepdims=True)
        else:
            # Large-M layers: matmul in M strips so output / sum / sum-of-squares
            # are produced in a single pass over each strip.
            s_acc = jnp.zeros((1, tn), jnp.float32)
            ss_acc = jnp.zeros((1, tn), jnp.float32)
            tm = 512
            for m0 in range(0, M, tm):
                mlen = min(tm, M - m0)
                acc = jnp.dot(patch_ref[pl.ds(m0, mlen), :], w,
                              preferred_element_type=jnp.float32)
                y_ref[0, pl.ds(m0, mlen), :] = acc
                s_acc = s_acc + jnp.sum(acc, axis=0, keepdims=True)
                ss_acc = ss_acc + jnp.sum(acc * acc, axis=0, keepdims=True)
            s_ref[0] = s_acc
            ss_ref[0] = ss_acc

    return kernel


def _pick_cout_tile(cout):
    # 256-wide output tiles match the 256-wide MXU on v6e/v7x; the compiler
    # splits them for v5e's 128-wide MXU, so 256 is safe everywhere.
    if cout % 256 == 0:
        return 256
    if cout % 128 == 0:
        return 128
    return cout


def conv_bn_stats(xps, w_mat, offsets, Ho, Wo, *, in_scale=None, in_shift=None):
    """xps: (N, Hps, Wps, Cs) padded (and space-to-depth'd for stride>1) input.
    w_mat: (G*Cs, Cout) im2col weight matrix (rows grouped by tap offset).
    Returns y (N, Ho*Wo, Cout) and per-image BN partial sums (N, 1, Cout) x2.
    If in_scale/in_shift are given, relu(x*scale+shift) with a restored zero
    padding ring is fused into the input load (previous layer's BN + ReLU)."""
    N, Hps, Wps, Cs = xps.shape
    GCs, Cout = w_mat.shape
    assert GCs == len(offsets) * Cs
    M = Ho * Wo
    fuse_in = in_scale is not None
    tn = _pick_cout_tile(Cout)
    Cn = Cout // tn

    patch_itemsize = jnp.dtype(w_mat.dtype).itemsize
    w_tile_bytes = GCs * tn * patch_itemsize
    x_block_bytes = Hps * Wps * Cs * jnp.dtype(xps.dtype).itemsize

    # Grid order: when the per-tile weight block dominates the per-image
    # activation block (late ResNet stages), keep weights VMEM-resident across
    # the batch instead of re-streaming them per image.
    weights_outer = (Cn > 1) and (N > 1) and (w_tile_bytes > x_block_bytes)
    if weights_outer:
        grid = (Cn, N)
        x_map = lambda c, n: (n, 0, 0, 0)
        w_map = lambda c, n: (0, c)
        v_map = lambda c, n: (0, 0, 0)
        y_map = lambda c, n: (n, 0, c)
        dims = ("parallel", "parallel")
        rebuild_every_step = True            # activation block changes each step
    else:
        grid = (N, Cn)
        x_map = lambda n, c: (n, 0, 0, 0)
        w_map = lambda n, c: (0, c)
        v_map = lambda n, c: (0, 0, 0)
        y_map = lambda n, c: (n, 0, c)
        # The inner axis reuses the im2col scratch -> keep it un-sharded.
        dims = ("parallel", "arbitrary")
        rebuild_every_step = False

    in_specs = [pl.BlockSpec((1, Hps, Wps, Cs), x_map),
                pl.BlockSpec((GCs, tn), w_map)]
    args = [xps, w_mat]
    if fuse_in:
        in_specs += [pl.BlockSpec((1, 1, Cs), v_map),
                     pl.BlockSpec((1, 1, Cs), v_map)]
        args += [in_scale.reshape(1, 1, Cs).astype(jnp.float32),
                 in_shift.reshape(1, 1, Cs).astype(jnp.float32)]

    # Explicit VMEM budget from the actual block sizes (double-buffered in/out
    # blocks + single-buffered im2col scratch), capped for v7x's 64 MiB VMEM.
    est = (2 * x_block_bytes + 2 * w_tile_bytes
           + 2 * (M * tn + 2 * tn) * 4
           + M * GCs * patch_itemsize
           + (8 * Cs * 4 if fuse_in else 0))
    vmem_limit = int(min(48 * 1024 * 1024,
                         max(8 * 1024 * 1024, int(1.5 * est) + (2 << 20))))

    return pl.pallas_call(
        _make_conv_kernel(offsets, Ho, Wo, fuse_in, rebuild_every_step),
        out_shape=(jax.ShapeDtypeStruct((N, M, Cout), jnp.float32),
                   jax.ShapeDtypeStruct((N, 1, Cout), jnp.float32),
                   jax.ShapeDtypeStruct((N, 1, Cout), jnp.float32)),
        grid=grid,
        in_specs=in_specs,
        out_specs=(pl.BlockSpec((1, M, tn), y_map),
                   pl.BlockSpec((1, 1, tn), y_map),
                   pl.BlockSpec((1, 1, tn), y_map)),
        scratch_shapes=[pltpu.VMEM((M, GCs), w_mat.dtype)],
        compiler_params=pltpu.CompilerParams(
            dimension_semantics=dims, vmem_limit_bytes=vmem_limit),
    )(*args)


# ----------------------- fused BN-affine (+add) + ReLU -----------------------

def _make_affine_relu_kernel(n_streams):
    def kernel(*refs):
        o_ref = refs[-1]
        acc = None
        for i in range(n_streams):
            x_ref, sc_ref, sh_ref = refs[3 * i], refs[3 * i + 1], refs[3 * i + 2]
            term = x_ref[...] * sc_ref[...] + sh_ref[...]
            acc = term if acc is None else acc + term
        o_ref[...] = jnp.maximum(acc, 0.0)
    return kernel


def _pick_row_tile(rows, lanes, n_streams):
    # Size by bytes: (n_streams inputs + 1 output) double-buffered f32 blocks,
    # kept around ~4 MiB so the kernel fits v5e's 16 MiB scoped-VMEM default
    # and leaves headroom on v7x's 64 MiB physical VMEM.
    budget = 4 << 20
    per_row = (n_streams + 1) * 2 * lanes * 4
    for t in (1024, 512, 256, 128, 64, 32, 16, 8):
        if t <= rows and t * per_row <= budget:
            return t
    return 8


def _affine_relu_2d(xs, scs, shs):
    R, L = xs[0].shape
    tm = _pick_row_tile(R, L, len(xs))
    Rp = -(-R // tm) * tm
    if Rp != R:                         # zero-pad rows; sliced off again below
        xs = [jnp.pad(x, ((0, Rp - R), (0, 0))) for x in xs]
    row = pl.BlockSpec((tm, L), lambda i: (i, 0))
    vec = pl.BlockSpec((1, L), lambda i: (0, 0))
    in_specs, args = [], []
    for x, sc, sh in zip(xs, scs, shs):
        in_specs += [row, vec, vec]
        args += [x, sc, sh]
    out = pl.pallas_call(
        _make_affine_relu_kernel(len(xs)),
        out_shape=jax.ShapeDtypeStruct((Rp, L), jnp.float32),
        grid=(Rp // tm,),
        in_specs=in_specs,
        out_specs=pl.BlockSpec((tm, L), lambda i: (i, 0)),
        compiler_params=pltpu.CompilerParams(dimension_semantics=("parallel",)),
    )(*args)
    return out[:R] if Rp != R else out


def affine_relu(streams):
    """relu(sum_i (x_i * scale_i + shift_i)); x_i (M, C), scale/shift (C,).
    When C < 128 the data is repacked to 128-wide lanes (lane-dense stores)."""
    M, C = streams[0][0].shape
    xs = [x for x, _, _ in streams]
    scs = [sc.reshape(-1) for _, sc, _ in streams]
    shs = [sh.reshape(-1) for _, _, sh in streams]
    if C < 128 and 128 % C == 0 and (M * C) % 128 == 0:
        L, R = 128, (M * C) // 128
        xs = [x.reshape(R, L) for x in xs]
        scs = [jnp.tile(sc, L // C).reshape(1, L) for sc in scs]
        shs = [jnp.tile(sh, L // C).reshape(1, L) for sh in shs]
        return _affine_relu_2d(xs, scs, shs).reshape(M, C)
    scs = [sc.reshape(1, C) for sc in scs]
    shs = [sh.reshape(1, C) for sh in shs]
    return _affine_relu_2d(xs, scs, shs)


# --------------------------------- JAX glue ----------------------------------

def space_to_depth(x, s):
    """(N, H, W, C) -> (N, ceil(H/s), ceil(W/s), s*s*C), channel order (ri, rj, c)."""
    if s == 1:
        return x
    N, H, W, C = x.shape
    Hs, Ws = -(-H // s) * s, -(-W // s) * s
    x = jnp.pad(x, ((0, 0), (0, Hs - H), (0, Ws - W), (0, 0)))
    x = x.reshape(N, Hs // s, s, Ws // s, s, C)
    x = jnp.transpose(x, (0, 1, 3, 2, 4, 5))
    return x.reshape(N, Hs // s, Ws // s, s * s * C)


def conv_w_to_im2col(w_oihw, s, dtype=jnp.bfloat16):
    """PyTorch conv weight (Cout, Cin, KH, KW) -> (G*s*s*Cin, Cout) im2col
    weight matrix + tap-group offsets (qi, qj), matching a space_to_depth(s)
    input (tap (di,dj) -> group (di//s, dj//s), channel block (di%s)*s + dj%s).
    Row ordering matches the in-kernel im2col scratch."""
    Cout, Cin, KH, KW = w_oihw.shape
    w = jnp.transpose(w_oihw, (2, 3, 1, 0)).astype(jnp.float32)   # (KH,KW,Cin,Cout)
    Cs = s * s * Cin
    blocks, offsets = [], []
    for qi in range((KH - 1) // s + 1):
        for qj in range((KW - 1) // s + 1):
            blk = jnp.zeros((Cs, Cout), jnp.float32)
            for ri in range(s):
                for rj in range(s):
                    di, dj = s * qi + ri, s * qj + rj
                    if di < KH and dj < KW:
                        c0 = (ri * s + rj) * Cin
                        blk = blk.at[c0:c0 + Cin, :].set(w[di, dj])
            blocks.append(blk)
            offsets.append((qi, qj))
    return jnp.concatenate(blocks, axis=0).astype(dtype), offsets, Cs


def shortcut_w_to_im2col(we_oihw, s, offsets, Cs, dtype=jnp.bfloat16):
    """1x1 shortcut conv (stride s) as extra im2col columns: with padding=1 the
    stride-s sample point is exactly the centre tap (1,1) of the 3x3 window, so
    the shortcut weight occupies only that tap's Cin rows."""
    Cout, Cin, _, _ = we_oihw.shape
    w = jnp.transpose(we_oihw[:, :, 0, 0], (1, 0)).astype(jnp.float32)  # (Cin,Cout)
    qi, qj, ri, rj = 1 // s, 1 // s, 1 % s, 1 % s
    g = offsets.index((qi, qj))
    row0 = g * Cs + (ri * s + rj) * Cin
    mat = jnp.zeros((len(offsets) * Cs, Cout), jnp.float32)
    mat = mat.at[row0:row0 + Cin, :].set(w)
    return mat.astype(dtype)


def bn_scale_shift(part_sum, part_sq, count, gamma, beta, eps=1e-5):
    """Fold train-mode (batch-stats, biased-variance) BN into scale/shift (C,)."""
    mean = jnp.sum(part_sum, axis=(0, 1)) / count
    var = jnp.maximum(jnp.sum(part_sq, axis=(0, 1)) / count - mean * mean, 0.0)
    inv = gamma * jax.lax.rsqrt(var + eps)
    return inv, beta - mean * inv


def restnet_down_block(x_nchw, params, stride, use_bf16_matmul=True):
    """RestNetDownBlock forward (train-mode BatchNorm). NCHW f32 in -> NCHW f32 out."""
    s0, s1 = stride
    wdt = jnp.bfloat16 if use_bf16_matmul else jnp.float32
    x = jnp.transpose(x_nchw, (0, 2, 3, 1)).astype(jnp.float32)        # NHWC
    N, H, W, Cin = x.shape
    Cout = params["w1"].shape[0]

    # ---- conv1 (3x3 stride s0 pad 1) + 1x1 shortcut (stride s0) in ONE kernel:
    # the shortcut's weights ride along as extra output columns placed on the
    # centre-tap rows of the im2col weight matrix (both convs read the same
    # strided window of x), so x is streamed from HBM exactly once.
    Ho1 = (H - 1) // s0 + 1
    Wo1 = (W - 1) // s0 + 1
    xp = space_to_depth(jnp.pad(x, ((0, 0), (1, 1), (1, 1), (0, 0))), s0)
    w1_mat, offs1, Cs1 = conv_w_to_im2col(params["w1"], s0, wdt)
    we_mat = shortcut_w_to_im2col(params["we"], s0, offs1, Cs1, wdt)
    w_comb = jnp.concatenate([w1_mat, we_mat], axis=1)                  # (GCs, 2*Cout)
    y_comb, s_comb, ss_comb = conv_bn_stats(xp, w_comb, offs1, Ho1, Wo1)
    y1, ye = y_comb[..., :Cout], y_comb[..., Cout:]
    cnt1 = N * Ho1 * Wo1
    sc1, sh1 = bn_scale_shift(s_comb[..., :Cout], ss_comb[..., :Cout], cnt1,
                              params["g1"], params["b1"])
    sc_e, sh_e = bn_scale_shift(s_comb[..., Cout:], ss_comb[..., Cout:], cnt1,
                                params["ge"], params["be"])

    # ---- conv2 (3x3 stride s1 pad 1); BN1 + ReLU fused into the im2col build.
    Ho2 = (Ho1 - 1) // s1 + 1
    Wo2 = (Wo1 - 1) // s1 + 1
    y1_img = y1.reshape(N, Ho1, Wo1, Cout)
    if s1 == 1:
        y1p = jnp.pad(y1_img, ((0, 0), (1, 1), (1, 1), (0, 0)))         # raw, pre-BN
        w2_mat, offs2, _ = conv_w_to_im2col(params["w2"], 1, wdt)
        y2, s2_, ss2 = conv_bn_stats(y1p, w2_mat, offs2, Ho2, Wo2,
                                     in_scale=sc1, in_shift=sh1)
    else:
        # TODO(synk): stride>1 second conv keeps BN1+ReLU as a separate kernel
        # (would need sc1/sh1 tiled through space_to_depth to fuse it here too).
        t1 = affine_relu([(y1.reshape(N * Ho1 * Wo1, Cout), sc1, sh1)])
        t1 = t1.reshape(N, Ho1, Wo1, Cout)
        t1p = space_to_depth(jnp.pad(t1, ((0, 0), (1, 1), (1, 1), (0, 0))), s1)
        w2_mat, offs2, _ = conv_w_to_im2col(params["w2"], s1, wdt)
        y2, s2_, ss2 = conv_bn_stats(t1p, w2_mat, offs2, Ho2, Wo2)
    sc2, sh2 = bn_scale_shift(s2_, ss2, N * Ho2 * Wo2, params["g2"], params["b2"])

    # ---- relu(BN2(conv2) + BN_extra(shortcut)), lane-dense fused elementwise.
    M = N * Ho2 * Wo2
    out = affine_relu([(y2.reshape(M, Cout), sc2, sh2),
                       (ye.reshape(M, Cout), sc_e, sh_e)])
    out = out.reshape(N, Ho2, Wo2, Cout)
    return jnp.transpose(out, (0, 3, 1, 2))                             # NCHW


# ------------------------- params, reference, demo ---------------------------

def init_params(key, in_channels, out_channels):
    k1, k2, ke = jax.random.split(key, 3)
    return {
        "w1": 0.1 * jax.random.normal(k1, (out_channels, in_channels, 3, 3), jnp.float32),
        "w2": 0.1 * jax.random.normal(k2, (out_channels, out_channels, 3, 3), jnp.float32),
        "we": 0.1 * jax.random.normal(ke, (out_channels, in_channels, 1, 1), jnp.float32),
        # BatchNorm affine params at PyTorch defaults (gamma=1, beta=0).
        # Conv biases omitted on purpose: they cancel exactly under train-mode BN.
        "g1": jnp.ones((out_channels,), jnp.float32),
        "b1": jnp.zeros((out_channels,), jnp.float32),
        "g2": jnp.ones((out_channels,), jnp.float32),
        "b2": jnp.zeros((out_channels,), jnp.float32),
        "ge": jnp.ones((out_channels,), jnp.float32),
        "be": jnp.zeros((out_channels,), jnp.float32),
    }


def reference_block(x_nchw, params, stride, eps=1e-5):
    """Plain-JAX (XLA) reference of the PyTorch forward (train-mode BN, no bias)."""
    def conv(x, w, s, pad):
        return jax.lax.conv_general_dilated(
            x, w, (s, s), [(pad, pad), (pad, pad)],
            dimension_numbers=("NCHW", "OIHW", "NCHW"),
            precision=jax.lax.Precision.HIGHEST)

    def bn(x, gamma, beta):
        mean = jnp.mean(x, axis=(0, 2, 3), keepdims=True)
        var = jnp.var(x, axis=(0, 2, 3), keepdims=True)
        return ((x - mean) * jax.lax.rsqrt(var + eps)
                * gamma.reshape(1, -1, 1, 1) + beta.reshape(1, -1, 1, 1))

    s0, s1 = stride
    extra = bn(conv(x_nchw, params["we"], s0, 0), params["ge"], params["be"])
    t = jax.nn.relu(bn(conv(x_nchw, params["w1"], s0, 1), params["g1"], params["b1"]))
    t = bn(conv(t, params["w2"], s1, 1), params["g2"], params["b2"])
    return jax.nn.relu(extra + t)


if __name__ == "__main__":
    key = jax.random.PRNGKey(0)
    kx, kp = jax.random.split(key)

    batch, in_ch, out_ch, hw = 2, 4, 8, 16
    stride = (2, 1)                               # typical ResNet down block
    x = jax.random.normal(kx, (batch, in_ch, hw, hw), jnp.float32)
    params = init_params(kp, in_ch, out_ch)

    # Default path: bf16 MXU operands, f32 accumulation / BN statistics.
    fwd = jax.jit(lambda xx, pp: restnet_down_block(xx, pp, stride))
    out = fwd(x, params)
    jax.block_until_ready(out)

    expected_shape = (batch, out_ch, hw // stride[0], hw // stride[0])
    assert out.shape == expected_shape, (out.shape, expected_shape)
    assert bool(jnp.all(out >= 0.0))              # final ReLU

    ref = reference_block(x, params, stride)
    err_bf16 = float(jnp.max(jnp.abs(out - ref)))
    assert err_bf16 < 1.5e-1, f"bf16-MXU mismatch vs plain-JAX reference: {err_bf16}"

    # f32-operand path cross-check (tight tolerance).
    out_f32 = jax.jit(lambda xx, pp: restnet_down_block(
        xx, pp, stride, use_bf16_matmul=False))(x, params)
    jax.block_until_ready(out_f32)
    err_f32 = float(jnp.max(jnp.abs(out_f32 - ref)))
    assert err_f32 < 5e-2, f"f32-MXU mismatch vs plain-JAX reference: {err_f32}"

    print("KERNEL_OK")
</pallas_src>

<mosaic_0001>
module attributes {stable_mosaic.version = 11 : i64} {
  func.func @kernel(%arg0: i32, %arg1: i32, %arg2: memref<1x9x9x16xf32, #tpu.memory_space<vmem>>, %arg3: memref<64x16xbf16, #tpu.memory_space<vmem>>, %arg4: memref<1x64x16xf32, #tpu.memory_space<vmem>>, %arg5: memref<1x1x16xf32, #tpu.memory_space<vmem>>, %arg6: memref<1x1x16xf32, #tpu.memory_space<vmem>>, %arg7: memref<64x64xbf16, #tpu.memory_space<vmem>>) attributes {dimension_semantics = [#tpu.dimension_semantics<parallel>, #tpu.dimension_semantics<arbitrary>], iteration_bounds = array<i64: 2, 1>, scalar_prefetch = 0 : i64, scratch_operands = 1 : i64, tpu.core_type = #tpu.core_type<tc>, window_params = [{transform_indices = @transform_0, window_bounds = array<i64: 1, 9, 9, 16>}, {transform_indices = @transform_1, window_bounds = array<i64: 64, 16>}, {transform_indices = @transform_2, window_bounds = array<i64: 1, 64, 16>}, {transform_indices = @transform_3, window_bounds = array<i64: 1, 1, 16>}, {transform_indices = @transform_4, window_bounds = array<i64: 1, 1, 16>}]} {
    %c0_i32 = arith.constant 0 : i32
    %0 = arith.cmpi eq, %arg1, %c0_i32 : i32
    %1 = arith.extui %0 : i1 to i32
    %c0_i32_0 = arith.constant 0 : i32
    %2 = arith.cmpi ne, %1, %c0_i32_0 : i32
    scf.if %2 {
      %c0_15 = arith.constant 0 : index
      %c0_16 = arith.constant 0 : index
      %c0_17 = arith.constant 0 : index
      %c0_18 = arith.constant 0 : index
      %20 = vector.load %arg2[%c0_15, %c0_16, %c0_17, %c0_18] : memref<1x9x9x16xf32, #tpu.memory_space<vmem>>, vector<1x9x9x16xf32>
      %21 = vector.shape_cast %20 : vector<1x9x9x16xf32> to vector<9x9x16xf32>
      %22 = arith.truncf %21 : vector<9x9x16xf32> to vector<9x9x16xbf16>
      %23 = vector.extract_strided_slice %22 {offsets = [0, 0, 0], sizes = [8, 8, 16], strides = [1, 1, 1]} : vector<9x9x16xbf16> to vector<8x8x16xbf16>
      %24 = vector.shape_cast %23 : vector<8x8x16xbf16> to vector<64x16xbf16>
      %25 = vector.extract_strided_slice %22 {offsets = [0, 1, 0], sizes = [8, 8, 16], strides = [1, 1, 1]} : vector<9x9x16xbf16> to vector<8x8x16xbf16>
      %26 = vector.shape_cast %25 : vector<8x8x16xbf16> to vector<64x16xbf16>
      %27 = vector.extract_strided_slice %22 {offsets = [1, 0, 0], sizes = [8, 8, 16], strides = [1, 1, 1]} : vector<9x9x16xbf16> to vector<8x8x16xbf16>
      %28 = vector.shape_cast %27 : vector<8x8x16xbf16> to vector<64x16xbf16>
      %29 = vector.extract_strided_slice %22 {offsets = [1, 1, 0], sizes = [8, 8, 16], strides = [1, 1, 1]} : vector<9x9x16xbf16> to vector<8x8x16xbf16>
      %30 = vector.shape_cast %29 : vector<8x8x16xbf16> to vector<64x16xbf16>
      %31 = tpu.concatenate %24, %26, %28, %30 in 1 : vector<64x16xbf16>, vector<64x16xbf16>, vector<64x16xbf16>, vector<64x16xbf16> -> vector<64x64xbf16>
      %c0_19 = arith.constant 0 : index
      %c0_20 = arith.constant 0 : index
      %32 = vector.load %arg7[%c0_19, %c0_20] : memref<64x64xbf16, #tpu.memory_space<vmem>>, vector<64x64xbf16>
      tpu.vector_store %arg7[%c0_19, %c0_20], %31 {strides = array<i32>} : memref<64x64xbf16, #tpu.memory_space<vmem>>, vector<64x64xbf16>,
    } else {
    }
    %c0 = arith.constant 0 : index
    %c0_1 = arith.constant 0 : index
    %3 = vector.load %arg3[%c0, %c0_1] : memref<64x16xbf16, #tpu.memory_space<vmem>>, vector<64x16xbf16>
    %c0_2 = arith.constant 0 : index
    %c0_3 = arith.constant 0 : index
    %4 = vector.load %arg7[%c0_2, %c0_3] : memref<64x64xbf16, #tpu.memory_space<vmem>>, vector<64x64xbf16>
    %cst = arith.constant dense<0.000000e+00> : vector<64x16xf32>
    %5 = tpu.matmul %4, %3, %cst {dimension_numbers = #tpu.dot_dimension_numbers<[1], [0], [0], [1], [0, 0, 1, 1], [], []>} : vector<64x64xbf16>, vector<64x16xbf16>, vector<64x16xf32> -> vector<64x16xf32>
    %c0_4 = arith.constant 0 : index
    %c0_5 = arith.constant 0 : index
    %c0_6 = arith.constant 0 : index
    %6 = vector.load %arg4[%c0_4, %c0_5, %c0_6] : memref<1x64x16xf32, #tpu.memory_space<vmem>>, vector<1x64x16xf32>
    %7 = vector.shape_cast %6 : vector<1x64x16xf32> to vector<64x16xf32>
    %8 = vector.shape_cast %5 : vector<64x16xf32> to vector<1x64x16xf32>
    tpu.vector_store %arg4[%c0_4, %c0_5, %c0_6], %8 {strides = array<i32>} : memref<1x64x16xf32, #tpu.memory_space<vmem>>, vector<1x64x16xf32>,
    %cst_7 = arith.constant dense<0.000000e+00> : vector<16xf32>
    %9 = vector.multi_reduction <add>, %5, %cst_7 [0] : vector<64x16xf32> to vector<16xf32>
    %10 = vector.shape_cast %9 : vector<16xf32> to vector<1x16xf32>
    %c0_8 = arith.constant 0 : index
    %c0_9 = arith.constant 0 : index
    %c0_10 = arith.constant 0 : index
    %11 = vector.load %arg5[%c0_8, %c0_9, %c0_10] : memref<1x1x16xf32, #tpu.memory_space<vmem>>, vector<1x1x16xf32>
    %12 = vector.shape_cast %11 : vector<1x1x16xf32> to vector<1x16xf32>
    %13 = vector.shape_cast %10 : vector<1x16xf32> to vector<1x1x16xf32>
    tpu.vector_store %arg5[%c0_8, %c0_9, %c0_10], %13 {strides = array<i32>} : memref<1x1x16xf32, #tpu.memory_space<vmem>>, vector<1x1x16xf32>,
    %14 = arith.mulf %5, %5 : vector<64x16xf32>
    %cst_11 = arith.constant dense<0.000000e+00> : vector<16xf32>
    %15 = vector.multi_reduction <add>, %14, %cst_11 [0] : vector<64x16xf32> to vector<16xf32>
    %16 = vector.shape_cast %15 : vector<16xf32> to vector<1x16xf32>
    %c0_12 = arith.constant 0 : index
    %c0_13 = arith.constant 0 : index
    %c0_14 = arith.constant 0 : index
    %17 = vector.load %arg6[%c0_12, %c0_13, %c0_14] : memref<1x1x16xf32, #tpu.memory_space<vmem>>, vector<1x1x16xf32>
    %18 = vector.shape_cast %17 : vector<1x1x16xf32> to vector<1x16xf32>
    %19 = vector.shape_cast %16 : vector<1x16xf32> to vector<1x1x16xf32>
    tpu.vector_store %arg6[%c0_12, %c0_13, %c0_14], %19 {strides = array<i32>} : memref<1x1x16xf32, #tpu.memory_space<vmem>>, vector<1x1x16xf32>,
    return
  }
  func.func @transform_0(%arg0: i32, %arg1: i32) -> (i32, i32, i32, i32) {
    %c0_i32 = arith.constant 0 : i32
    %c0_i32_0 = arith.constant 0 : i32
    %c0_i32_1 = arith.constant 0 : i32
    %c0_i32_2 = arith.constant 0 : i32
    return %arg0, %c0_i32, %c0_i32_0, %c0_i32_1 : i32, i32, i32, i32
  }
  func.func @transform_1(%arg0: i32, %arg1: i32) -> (i32, i32) {
    %c0_i32 = arith.constant 0 : i32
    %c0_i32_0 = arith.constant 0 : i32
    return %c0_i32, %arg1 : i32, i32
  }
  func.func @transform_2(%arg0: i32, %arg1: i32) -> (i32, i32, i32) {
    %c0_i32 = arith.constant 0 : i32
    %c0_i32_0 = arith.constant 0 : i32
    return %arg0, %c0_i32, %arg1 : i32, i32, i32
  }
  func.func @transform_3(%arg0: i32, %arg1: i32) -> (i32, i32, i32) {
    %c0_i32 = arith.constant 0 : i32
    %c0_i32_0 = arith.constant 0 : i32
    return %arg0, %c0_i32, %arg1 : i32, i32, i32
  }
  func.func @transform_4(%arg0: i32, %arg1: i32) -> (i32, i32, i32) {
    %c0_i32 = arith.constant 0 : i32
    %c0_i32_0 = arith.constant 0 : i32
    return %arg0, %c0_i32, %arg1 : i32, i32, i32
  }
}

module attributes {stable_mosaic.version = 11 : i64} {
  func.func @kernel(%arg0: i32, %arg1: i32, %arg2: memref<1x10x10x8xf32, #tpu.memory_space<vmem>>, %arg3: memref<72x8xbf16, #tpu.memory_space<vmem>>, %arg4: memref<1x1x8xf32, #tpu.memory_space<vmem>>, %arg5: memref<1x1x8xf32, #tpu.memory_space<vmem>>, %arg6: memref<1x64x8xf32, #tpu.memory_space<vmem>>, %arg7: memref<1x1x8xf32, #tpu.memory_space<vmem>>, %arg8: memref<1x1x8xf32, #tpu.memory_space<vmem>>, %arg9: memref<64x72xbf16, #tpu.memory_space<vmem>>) attributes {dimension_semantics = [#tpu.dimension_semantics<parallel>, #tpu.dimension_semantics<arbitrary>], iteration_bounds = array<i64: 2, 1>, scalar_prefetch = 0 : i64, scratch_operands = 1 : i64, tpu.core_type = #tpu.core_type<tc>, window_params = [{transform_indices = @transform_0, window_bounds = array<i64: 1, 10, 10, 8>}, {transform_indices = @transform_1, window_bounds = array<i64: 72, 8>}, {pipeline_mode = #tpu.pipeline_mode<synchronous>, transform_indices = @transform_2, window_bounds = array<i64: 1, 1, 8>}, {pipeline_mode = #tpu.pipeline_mode<synchronous>, transform_indices = @transform_3, window_bounds = array<i64: 1, 1, 8>}, {transform_indices = @transform_4, window_bounds = array<i64: 1, 64, 8>}, {transform_indices = @transform_5, window_bounds = array<i64: 1, 1, 8>}, {transform_indices = @transform_6, window_bounds = array<i64: 1, 1, 8>}]} {
    %c0_i32 = arith.constant 0 : i32
    %0 = arith.cmpi eq, %arg1, %c0_i32 : i32
    %1 = arith.extui %0 : i1 to i32
    %c0_i32_0 = arith.constant 0 : i32
    %2 = arith.cmpi ne, %1, %c0_i32_0 : i32
    scf.if %2 {
      %c0_15 = arith.constant 0 : index
      %c0_16 = arith.constant 0 : index
      %c0_17 = arith.constant 0 : index
      %c0_18 = arith.constant 0 : index
      %20 = vector.load %arg2[%c0_15, %c0_16, %c0_17, %c0_18] : memref<1x10x10x8xf32, #tpu.memory_space<vmem>>, vector<1x10x10x8xf32>
      %21 = vector.shape_cast %20 : vector<1x10x10x8xf32> to vector<10x10x8xf32>
      %c0_19 = arith.constant 0 : index
      %c0_20 = arith.constant 0 : index
      %c0_21 = arith.constant 0 : index
      %22 = vector.load %arg4[%c0_19, %c0_20, %c0_21] : memref<1x1x8xf32, #tpu.memory_space<vmem>>, vector<1x1x8xf32>
      %23 = vector.broadcast %22 : vector<1x1x8xf32> to vector<10x10x8xf32>
      %24 = arith.mulf %21, %23 : vector<10x10x8xf32>
      %c0_22 = arith.constant 0 : index
      %c0_23 = arith.constant 0 : index
      %c0_24 = arith.constant 0 : index
      %25 = vector.load %arg5[%c0_22, %c0_23, %c0_24] : memref<1x1x8xf32, #tpu.memory_space<vmem>>, vector<1x1x8xf32>
      %26 = vector.broadcast %25 : vector<1x1x8xf32> to vector<10x10x8xf32>
      %27 = arith.addf %24, %26 : vector<10x10x8xf32>
      %cst_25 = arith.constant 0.000000e+00 : f32
      %28 = vector.broadcast %cst_25 : f32 to vector<10x10x8xf32>
      %29 = arith.maximumf %27, %28 : vector<10x10x8xf32>
      %30 = tpu.iota {dimensions = array<i32: 0>} : vector<10x10x8xi32>
      %31 = tpu.iota {dimensions = array<i32: 1>} : vector<10x10x8xi32>
      %c1_i32 = arith.constant 1 : i32
      %32 = vector.broadcast %c1_i32 : i32 to vector<10x10x8xi32>
      %33 = arith.cmpi sge, %30, %32 : vector<10x10x8xi32>
      %c8_i32 = arith.constant 8 : i32
      %34 = vector.broadcast %c8_i32 : i32 to vector<10x10x8xi32>
      %35 = arith.cmpi sle, %30, %34 : vector<10x10x8xi32>
      %36 = arith.andi %33, %35 : vector<10x10x8xi1>
      %c1_i32_26 = arith.constant 1 : i32
      %37 = vector.broadcast %c1_i32_26 : i32 to vector<10x10x8xi32>
      %38 = arith.cmpi sge, %31, %37 : vector<10x10x8xi32>
      %39 = arith.andi %36, %38 : vector<10x10x8xi1>
      %c8_i32_27 = arith.constant 8 : i32
      %40 = vector.broadcast %c8_i32_27 : i32 to vector<10x10x8xi32>
      %41 = arith.cmpi sle, %31, %40 : vector<10x10x8xi32>
      %42 = arith.andi %39, %41 : vector<10x10x8xi1>
      %cst_28 = arith.constant 0.000000e+00 : f32
      %43 = vector.broadcast %cst_28 : f32 to vector<10x10x8xf32>
      %44 = arith.select %42, %29, %43 : vector<10x10x8xi1>, vector<10x10x8xf32>
      %45 = arith.truncf %44 : vector<10x10x8xf32> to vector<10x10x8xbf16>
      %46 = vector.extract_strided_slice %45 {offsets = [0, 0, 0], sizes = [8, 8, 8], strides = [1, 1, 1]} : vector<10x10x8xbf16> to vector<8x8x8xbf16>
      %47 = vector.shape_cast %46 : vector<8x8x8xbf16> to vector<64x8xbf16>
      %48 = vector.extract_strided_slice %45 {offsets = [0, 1, 0], sizes = [8, 8, 8], strides = [1, 1, 1]} : vector<10x10x8xbf16> to vector<8x8x8xbf16>
      %49 = vector.shape_cast %48 : vector<8x8x8xbf16> to vector<64x8xbf16>
      %50 = vector.extract_strided_slice %45 {offsets = [0, 2, 0], sizes = [8, 8, 8], strides = [1, 1, 1]} : vector<10x10x8xbf16> to vector<8x8x8xbf16>
      %51 = vector.shape_cast %50 : vector<8x8x8xbf16> to vector<64x8xbf16>
      %52 = vector.extract_strided_slice %45 {offsets = [1, 0, 0], sizes = [8, 8, 8], strides = [1, 1, 1]} : vector<10x10x8xbf16> to vector<8x8x8xbf16>
      %53 = vector.shape_cast %52 : vector<8x8x8xbf16> to vector<64x8xbf16>
      %54 = vector.extract_strided_slice %45 {offsets = [1, 1, 0], sizes = [8, 8, 8], strides = [1, 1, 1]} : vector<10x10x8xbf16> to vector<8x8x8xbf16>
      %55 = vector.shape_cast %54 : vector<8x8x8xbf16> to vector<64x8xbf16>
      %56 = vector.extract_strided_slice %45 {offsets = [1, 2, 0], sizes = [8, 8, 8], strides = [1, 1, 1]} : vector<10x10x8xbf16> to vector<8x8x8xbf16>
      %57 = vector.shape_cast %56 : vector<8x8x8xbf16> to vector<64x8xbf16>
      %58 = vector.extract_strided_slice %45 {offsets = [2, 0, 0], sizes = [8, 8, 8], strides = [1, 1, 1]} : vector<10x10x8xbf16> to vector<8x8x8xbf16>
      %59 = vector.shape_cast %58 : vector<8x8x8xbf16> to vector<64x8xbf16>
      %60 = vector.extract_strided_slice %45 {offsets = [2, 1, 0], sizes = [8, 8, 8], strides = [1, 1, 1]} : vector<10x10x8xbf16> to vector<8x8x8xbf16>
      %61 = vector.shape_cast %60 : vector<8x8x8xbf16> to vector<64x8xbf16>
      %62 = vector.extract_strided_slice %45 {offsets = [2, 2, 0], sizes = [8, 8, 8], strides = [1, 1, 1]} : vector<10x10x8xbf16> to vector<8x8x8xbf16>
      %63 = vector.shape_cast %62 : vector<8x8x8xbf16> to vector<64x8xbf16>
      %64 = tpu.concatenate %47, %49, %51, %53, %55, %57, %59, %61, %63 in 1 : vector<64x8xbf16>, vector<64x8xbf16>, vector<64x8xbf16>, vector<64x8xbf16>, vector<64x8xbf16>, vector<64x8xbf16>, vector<64x8xbf16>, vector<64x8xbf16>, vector<64x8xbf16> -> vector<64x72xbf16>
      %c0_29 = arith.constant 0 : index
      %c0_30 = arith.constant 0 : index
      %65 = vector.load %arg9[%c0_29, %c0_30] : memref<64x72xbf16, #tpu.memory_space<vmem>>, vector<64x72xbf16>
      tpu.vector_store %arg9[%c0_29, %c0_30], %64 {strides = array<i32>} : memref<64x72xbf16, #tpu.memory_space<vmem>>, vector<64x72xbf16>,
    } else {
    }
    %c0 = arith.constant 0 : index
    %c0_1 = arith.constant 0 : index
    %3 = vector.load %arg3[%c0, %c0_1] : memref<72x8xbf16, #tpu.memory_space<vmem>>, vector<72x8xbf16>
    %c0_2 = arith.constant 0 : index
    %c0_3 = arith.constant 0 : index
    %4 = vector.load %arg9[%c0_2, %c0_3] : memref<64x72xbf16, #tpu.memory_space<vmem>>, vector<64x72xbf16>
    %cst = arith.constant dense<0.000000e+00> : vector<64x8xf32>
    %5 = tpu.matmul %4, %3, %cst {dimension_numbers = #tpu.dot_dimension_numbers<[1], [0], [0], [1], [0, 0, 1, 1], [], []>} : vector<64x72xbf16>, vector<72x8xbf16>, vector<64x8xf32> -> vector<64x8xf32>
    %c0_4 = arith.constant 0 : index
    %c0_5 = arith.constant 0 : index
    %c0_6 = arith.constant 0 : index
    %6 = vector.load %arg6[%c0_4, %c0_5, %c0_6] : memref<1x64x8xf32, #tpu.memory_space<vmem>>, vector<1x64x8xf32>
    %7 = vector.shape_cast %6 : vector<1x64x8xf32> to vector<64x8xf32>
    %8 = vector.shape_cast %5 : vector<64x8xf32> to vector<1x64x8xf32>
    tpu.vector_store %arg6[%c0_4, %c0_5, %c0_6], %8 {strides = array<i32>} : memref<1x64x8xf32, #tpu.memory_space<vmem>>, vector<1x64x8xf32>,
    %cst_7 = arith.constant dense<0.000000e+00> : vector<8xf32>
    %9 = vector.multi_reduction <add>, %5, %cst_7 [0] : vector<64x8xf32> to vector<8xf32>
    %10 = vector.shape_cast %9 : vector<8xf32> to vector<1x8xf32>
    %c0_8 = arith.constant 0 : index
    %c0_9 = arith.constant 0 : index
    %c0_10 = arith.constant 0 : index
    %11 = vector.load %arg7[%c0_8, %c0_9, %c0_10] : memref<1x1x8xf32, #tpu.memory_space<vmem>>, vector<1x1x8xf32>
    %12 = vector.shape_cast %11 : vector<1x1x8xf32> to vector<1x8xf32>
    %13 = vector.shape_cast %10 : vector<1x8xf32> to vector<1x1x8xf32>
    tpu.vector_store %arg7[%c0_8, %c0_9, %c0_10], %13 {strides = array<i32>} : memref<1x1x8xf32, #tpu.memory_space<vmem>>, vector<1x1x8xf32>,
    %14 = arith.mulf %5, %5 : vector<64x8xf32>
    %cst_11 = arith.constant dense<0.000000e+00> : vector<8xf32>
    %15 = vector.multi_reduction <add>, %14, %cst_11 [0] : vector<64x8xf32> to vector<8xf32>
    %16 = vector.shape_cast %15 : vector<8xf32> to vector<1x8xf32>
    %c0_12 = arith.constant 0 : index
    %c0_13 = arith.constant 0 : index
    %c0_14 = arith.constant 0 : index
    %17 = vector.load %arg8[%c0_12, %c0_13, %c0_14] : memref<1x1x8xf32, #tpu.memory_space<vmem>>, vector<1x1x8xf32>
    %18 = vector.shape_cast %17 : vector<1x1x8xf32> to vector<1x8xf32>
    %19 = vector.shape_cast %16 : vector<1x8xf32> to vector<1x1x8xf32>
    tpu.vector_store %arg8[%c0_12, %c0_13, %c0_14], %19 {strides = array<i32>} : memref<1x1x8xf32, #tpu.memory_space<vmem>>, vector<1x1x8xf32>,
    return
  }
  func.func @transform_0(%arg0: i32, %arg1: i32) -> (i32, i32, i32, i32) {
    %c0_i32 = arith.constant 0 : i32
    %c0_i32_0 = arith.constant 0 : i32
    %c0_i32_1 = arith.constant 0 : i32
    %c0_i32_2 = arith.constant 0 : i32
    return %arg0, %c0_i32, %c0_i32_0, %c0_i32_1 : i32, i32, i32, i32
  }
  func.func @transform_1(%arg0: i32, %arg1: i32) -> (i32, i32) {
    %c0_i32 = arith.constant 0 : i32
    %c0_i32_0 = arith.constant 0 : i32
    return %c0_i32, %arg1 : i32, i32
  }
  func.func @transform_2(%arg0: i32, %arg1: i32) -> (i32, i32, i32) {
    %c0_i32 = arith.constant 0 : i32
    %c0_i32_0 = arith.constant 0 : i32
    %c0_i32_1 = arith.constant 0 : i32
    %c0_i32_2 = arith.constant 0 : i32
    return %c0_i32, %c0_i32_0, %c0_i32_1 : i32, i32, i32
  }
  func.func @transform_3(%arg0: i32, %arg1: i32) -> (i32, i32, i32) {
    %c0_i32 = arith.constant 0 : i32
    %c0_i32_0 = arith.constant 0 : i32
    %c0_i32_1 = arith.constant 0 : i32
    %c0_i32_2 = arith.constant 0 : i32
    return %c0_i32, %c0_i32_0, %c0_i32_1 : i32, i32, i32
  }
  func.func @transform_4(%arg0: i32, %arg1: i32) -> (i32, i32, i32) {
    %c0_i32 = arith.constant 0 : i32
    %c0_i32_0 = arith.constant 0 : i32
    return %arg0, %c0_i32, %arg1 : i32, i32, i32
  }
  func.func @transform_5(%arg0: i32, %arg1: i32) -> (i32, i32, i32) {
    %c0_i32 = arith.constant 0 : i32
    %c0_i32_0 = arith.constant 0 : i32
    return %arg0, %c0_i32, %arg1 : i32, i32, i32
  }
  func.func @transform_6(%arg0: i32, %arg1: i32) -> (i32, i32, i32) {
    %c0_i32 = arith.constant 0 : i32
    %c0_i32_0 = arith.constant 0 : i32
    return %arg0, %c0_i32, %arg1 : i32, i32, i32
  }
}

module attributes {stable_mosaic.version = 11 : i64} {
  func.func @kernel(%arg0: i32, %arg1: memref<8x128xf32, #tpu.memory_space<vmem>>, %arg2: memref<1x128xf32, #tpu.memory_space<vmem>>, %arg3: memref<1x128xf32, #tpu.memory_space<vmem>>, %arg4: memref<8x128xf32, #tpu.memory_space<vmem>>, %arg5: memref<1x128xf32, #tpu.memory_space<vmem>>, %arg6: memref<1x128xf32, #tpu.memory_space<vmem>>, %arg7: memref<8x128xf32, #tpu.memory_space<vmem>>) attributes {dimension_semantics = [#tpu.dimension_semantics<parallel>], iteration_bounds = array<i64: 1>, scalar_prefetch = 0 : i64, scratch_operands = 0 : i64, tpu.core_type = #tpu.core_type<tc>, window_params = [{transform_indices = @transform_0, window_bounds = array<i64: 8, 128>}, {pipeline_mode = #tpu.pipeline_mode<synchronous>, transform_indices = @transform_1, window_bounds = array<i64: 1, 128>}, {pipeline_mode = #tpu.pipeline_mode<synchronous>, transform_indices = @transform_2, window_bounds = array<i64: 1, 128>}, {transform_indices = @transform_3, window_bounds = array<i64: 8, 128>}, {pipeline_mode = #tpu.pipeline_mode<synchronous>, transform_indices = @transform_4, window_bounds = array<i64: 1, 128>}, {pipeline_mode = #tpu.pipeline_mode<synchronous>, transform_indices = @transform_5, window_bounds = array<i64: 1, 128>}, {transform_indices = @transform_6, window_bounds = array<i64: 8, 128>}]} {
    %c0 = arith.constant 0 : index
    %c0_0 = arith.constant 0 : index
    %0 = vector.load %arg1[%c0, %c0_0] : memref<8x128xf32, #tpu.memory_space<vmem>>, vector<8x128xf32>
    %c0_1 = arith.constant 0 : index
    %c0_2 = arith.constant 0 : index
    %1 = vector.load %arg2[%c0_1, %c0_2] : memref<1x128xf32, #tpu.memory_space<vmem>>, vector<1x128xf32>
    %2 = vector.broadcast %1 : vector<1x128xf32> to vector<8x128xf32>
    %3 = arith.mulf %0, %2 : vector<8x128xf32>
    %c0_3 = arith.constant 0 : index
    %c0_4 = arith.constant 0 : index
    %4 = vector.load %arg3[%c0_3, %c0_4] : memref<1x128xf32, #tpu.memory_space<vmem>>, vector<1x128xf32>
    %5 = vector.broadcast %4 : vector<1x128xf32> to vector<8x128xf32>
    %6 = arith.addf %3, %5 : vector<8x128xf32>
    %c0_5 = arith.constant 0 : index
    %c0_6 = arith.constant 0 : index
    %7 = vector.load %arg4[%c0_5, %c0_6] : memref<8x128xf32, #tpu.memory_space<vmem>>, vector<8x128xf32>
    %c0_7 = arith.constant 0 : index
    %c0_8 = arith.constant 0 : index
    %8 = vector.load %arg5[%c0_7, %c0_8] : memref<1x128xf32, #tpu.memory_space<vmem>>, vector<1x128xf32>
    %9 = vector.broadcast %8 : vector<1x128xf32> to vector<8x128xf32>
    %10 = arith.mulf %7, %9 : vector<8x128xf32>
    %c0_9 = arith.constant 0 : index
    %c0_10 = arith.constant 0 : index
    %11 = vector.load %arg6[%c0_9, %c0_10] : memref<1x128xf32, #tpu.memory_space<vmem>>, vector<1x128xf32>
    %12 = vector.broadcast %11 : vector<1x128xf32> to vector<8x128xf32>
    %13 = arith.addf %10, %12 : vector<8x128xf32>
    %14 = arith.addf %6, %13 : vector<8x128xf32>
    %cst = arith.constant 0.000000e+00 : f32
    %15 = vector.broadcast %cst : f32 to vector<8x128xf32>
    %16 = arith.maximumf %14, %15 : vector<8x128xf32>
    %c0_11 = arith.constant 0 : index
    %c0_12 = arith.constant 0 : index
    %17 = vector.load %arg7[%c0_11, %c0_12] : memref<8x128xf32, #tpu.memory_space<vmem>>, vector<8x128xf32>
    tpu.vector_store %arg7[%c0_11, %c0_12], %16 {strides = array<i32>} : memref<8x128xf32, #tpu.memory_space<vmem>>, vector<8x128xf32>,
    return
  }
  func.func @transform_0(%arg0: i32) -> (i32, i32) {
    %c0_i32 = arith.constant 0 : i32
    %c0_i32_0 = arith.constant 0 : i32
    return %arg0, %c0_i32 : i32, i32
  }
  func.func @transform_1(%arg0: i32) -> (i32, i32) {
    %c0_i32 = arith.constant 0 : i32
    %c0_i32_0 = arith.constant 0 : i32
    %c0_i32_1 = arith.constant 0 : i32
    return %c0_i32, %c0_i32_0 : i32, i32
  }
  func.func @transform_2(%arg0: i32) -> (i32, i32) {
    %c0_i32 = arith.constant 0 : i32
    %c0_i32_0 = arith.constant 0 : i32
    %c0_i32_1 = arith.constant 0 : i32
    return %c0_i32, %c0_i32_0 : i32, i32
  }
  func.func @transform_3(%arg0: i32) -> (i32, i32) {
    %c0_i32 = arith.constant 0 : i32
    %c0_i32_0 = arith.constant 0 : i32
    return %arg0, %c0_i32 : i32, i32
  }
  func.func @transform_4(%arg0: i32) -> (i32, i32) {
    %c0_i32 = arith.constant 0 : i32
    %c0_i32_0 = arith.constant 0 : i32
    %c0_i32_1 = arith.constant 0 : i32
    return %c0_i32, %c0_i32_0 : i32, i32
  }
  func.func @transform_5(%arg0: i32) -> (i32, i32) {
    %c0_i32 = arith.constant 0 : i32
    %c0_i32_0 = arith.constant 0 : i32
    %c0_i32_1 = arith.constant 0 : i32
    return %c0_i32, %c0_i32_0 : i32, i32
  }
  func.func @transform_6(%arg0: i32) -> (i32, i32) {
    %c0_i32 = arith.constant 0 : i32
    %c0_i32_0 = arith.constant 0 : i32
    return %arg0, %c0_i32 : i32, i32
  }
}

</mosaic_0001>

<bundles_post_ra>
// kernel: tile.23
= control target key start
LH: loop header
LB: loop body
LE: loop exit
PB: predicated region body
PF: predicated region fallthrough
CT: control target
= control target key end

     0   :  { %s28_s0 = inlined_call_operand.vmem [shape: f32[8], index: 0, kind: input, shape index: {}]   ;;  %s29_s1 = inlined_call_operand.vmem [shape: f32[16,8], index: 1, kind: output, shape index: {}]  }
   0x1   :  { %v4_v0 = vld [vmem:[%s28_s0] ss:$0 sm:$0xff] }
   0x2   :  { %5 = vst [vmem:[%s29_s1] sm:$0xff] %v4_v0 }
   0x3   :  { %8 = vst [vmem:[%s29_s1 + $0x8] sm:$0xff] %v4_v0 }

// kernel: tile.24
= control target key start
LH: loop header
LB: loop body
LE: loop exit
PB: predicated region body
PF: predicated region fallthrough
CT: control target
= control target key end

     0   :  { %s131_s10 = smov 120   ;;  %s132_s11 = smov 104   ;;  %vm3_vm0 = vcmask 64512   ;;  %vm9_vm1 = vcmask 1048512   ;;  %vm15_vm2 = vcmask 982912   ;;  %vm21_vm3 = vcmask 917312   ;;  %s207_s0 = inlined_call_operand.vmem [shape: f32[16,8], index: 0, kind: input, shape index: {}]   ;;  %s208_s1 = inlined_call_operand.vmem [shape: f32[1,128], index: 1, kind: output, shape index: {}]  }
   0x1   :  { %v101_v0 = vld [vmem:[%s207_s0 + $0xf] sm:$0x1]   ;;  %v103_v1 = vld [vmem:[%s207_s0 + $0xd] sm:$0x1]   ;;  %v105_v2 = vld [vmem:[%s207_s0 + $0xb] sm:$0x1]  }
   0x2   :  { %7 = vrot.lane.b32.xlu0 %v101_v0, %s131_s10  ;;  %19 = vrot.lane.b32.xlu1 %v103_v1, %s132_s11  ;;  %s133_s14 = smov 88   ;;  %v102_v3 = vld [vmem:[%s207_s0 + $0xe] sm:$0x1]   ;;  %v104_v4 = vld [vmem:[%s207_s0 + $0xc] sm:$0x1]   ;;  %s134_s19 = smov 112  }
   0x3   :  { %31 = vrot.lane.b32.xlu2 %v105_v2, %s133_s14  ;;  %s135_s20 = smov 96   ;;  %v106_v5 = vld [vmem:[%s207_s0 + $0xa] sm:$0x1]   ;;  %s136_s23 = smov 80   ;;  %v107_v6 = vld [vmem:[%s207_s0 + $0x9] sm:$0x1]  }
   0x4   :  { %v108_v7 = vld [vmem:[%s207_s0 + $0x8] sm:$0x1]   ;;  %s137_s28 = smov 72   ;;  %s138_s29 = smov 64   ;;  %v109_v8 = vld [vmem:[%s207_s0 + $0x7] sm:$0x1]  }
   0x5   :  { %s139_s3 = smov 56   ;;  %v110_v9 = vld [vmem:[%s207_s0 + $0x6] sm:$0x1]   ;;  %v111_v10 = vld [vmem:[%s207_s0 + $0x5] sm:$0x1]   ;;  %s140_s8 = smov 48  }
   0x6   :  { %s141_s9 = smov 40   ;;  %v112_v11 = vld [vmem:[%s207_s0 + $0x4] sm:$0x1]   ;;  %s142_s12 = smov 32   ;;  %v113_v12 = vld [vmem:[%s207_s0 + $0x3] sm:$0x1]  }
   0x7   :  { %v114_v13 = vld [vmem:[%s207_s0 + $0x2] sm:$0x1]   ;;  %s143_s17 = smov 24   ;;  %s144_s18 = smov 16   ;;  %v115_v14 = vld [vmem:[%s207_s0 + $0x1] sm:$0x1]  }
   0x8   :  { %s145_s21 = smov 8   ;;  %v2_v15 = vld [vmem:[%s207_s0] sm:$0x1]   ;;  %vm27_vm4 = vcmask 851712   ;;  %vm33_vm5 = vcmask 786112   ;;  %vm39_vm6 = vcmask 720512  }
   0x9   :  { %4 = vst.msk [vmem:[#allocation0] sm:$0x1] %vm3_vm0, %v2_v15   ;;  %vm45_vm7 = vcmask 654912   ;;  %vm51_vm8 = vcmask 589312   ;;  %vm57_vm9 = vcmask 523712   ;;  %vm63_vm10 = vcmask 458112  }
   0xa   :  { %13 = vrot.lane.b32.xlu0 %v102_v3, %s134_s19  ;;  %25 = vrot.lane.b32.xlu1 %v104_v4, %s135_s20  ;;  %vm69_vm11 = vcmask 392512   ;;  %vm75_vm12 = vcmask 326912   ;;  %vm81_vm13 = vcmask 261312   ;;  %vm87_vm14 = vcmask 195712  }
   0xb   :  { %37 = vrot.lane.b32.xlu2 %v106_v5, %s136_s23  ;;  %vm93_vm15 = vcmask 130112  }
  0x12   :  { %43 = vrot.lane.b32.xlu0 %v107_v6, %s137_s28  ;;  %49 = vrot.lane.b32.xlu1 %v108_v7, %s138_s29 }
  0x13   :  { %55 = vrot.lane.b32.xlu2 %v109_v8, %s139_s3 }
  0x1a   :  { %61 = vrot.lane.b32.xlu0 %v110_v9, %s140_s8  ;;  %67 = vrot.lane.b32.xlu1 %v111_v10, %s141_s9 }
  0x1b   :  { %73 = vrot.lane.b32.xlu2 %v112_v11, %s142_s12 }
  0x22   :  { %79 = vrot.lane.b32.xlu0 %v113_v12, %s143_s17  ;;  %85 = vrot.lane.b32.xlu1 %v114_v13, %s144_s18 }
  0x23   :  { %91 = vrot.lane.b32.xlu2 %v115_v14, %s145_s21 }
  0x5d   :  { %v32_v16 = vpop.permute.xlu2 %31  }
  0x65   :  { %v38_v17 = vpop.permute.xlu2 %37  }
  0x6d   :  { %v56_v18 = vpop.permute.xlu2 %55  }
  0x74   :  { %v8_v19 = vpop.permute.xlu0 %7   ;;  %v20_v20 = vpop.permute.xlu1 %19  }
  0x75   :  { %10 = vst.msk [vmem:[#allocation0] sm:$0x1] %vm9_vm1, %v8_v19   ;;  %v74_v21 = vpop.permute.xlu2 %73  }
  0x7c   :  { %v14_v22 = vpop.permute.xlu0 %13   ;;  %v26_v23 = vpop.permute.xlu1 %25  }
  0x7d   :  { %16 = vst.msk [vmem:[#allocation0] sm:$0x1] %vm15_vm2, %v14_v22   ;;  %v92_v24 = vpop.permute.xlu2 %91  }
  0x7e   :  { %22 = vst.msk [vmem:[#allocation0] sm:$0x1] %vm21_vm3, %v20_v20  }
  0x7f   :  { %28 = vst.msk [vmem:[#allocation0] sm:$0x1] %vm27_vm4, %v26_v23  }
  0x80   :  { %34 = vst.msk [vmem:[#allocation0] sm:$0x1] %vm33_vm5, %v32_v16  }
  0x81   :  { %40 = vst.msk [vmem:[#allocation0] sm:$0x1] %vm39_vm6, %v38_v17  }
  0x84   :  { %v44_v25 = vpop.permute.xlu0 %43   ;;  %v50_v26 = vpop.permute.xlu1 %49  }
  0x85   :  { %46 = vst.msk [vmem:[#allocation0] sm:$0x1] %vm45_vm7, %v44_v25  }
  0x86   :  { %52 = vst.msk [vmem:[#allocation0] sm:$0x1] %vm51_vm8, %v50_v26  }
  0x87   :  { %58 = vst.msk [vmem:[#allocation0] sm:$0x1] %vm57_vm9, %v56_v18  }
  0x8c   :  { %v62_v27 = vpop.permute.xlu0 %61   ;;  %v68_v28 = vpop.permute.xlu1 %67  }
  0x8d   :  { %64 = vst.msk [vmem:[#allocation0] sm:$0x1] %vm63_vm10, %v62_v27  }
  0x8e   :  { %70 = vst.msk [vmem:[#allocation0] sm:$0x1] %vm69_vm11, %v68_v28  }
  0x8f   :  { %76 = vst.msk [vmem:[#allocation0] sm:$0x1] %vm75_vm12, %v74_v21  }
  0x94   :  { %v80_v29 = vpop.permute.xlu0 %79   ;;  %v86_v30 = vpop.permute.xlu1 %85  }
  0x95   :  { %82 = vst.msk [vmem:[#allocation0] sm:$0x1] %vm81_vm13, %v80_v29  }
  0x96   :  { %88 = vst.msk [vmem:[#allocation0] sm:$0x1] %vm87_vm14, %v86_v30  }
  0x97   :  { %94 = vst.msk [vmem:[#allocation0] sm:$0x1] %vm93_vm15, %v92_v24  }
  0x9e   :  { %v97_v31 = vld [vmem:[#allocation0] sm:$0x1] }
  0x9f   :  { %100 = vst [vmem:[%s208_s1] sm:$0x1] %v97_v31 }

// kernel: _lambda_.3
= control target key start
LH: loop header
LB: loop body
LE: loop exit
PB: predicated region body
PF: predicated region fallthrough
CT: control target
= control target key end

     0   :  { %s1048_s15 = smov 0   ;;  %s1050_s16 = smov 0   ;;  %s1260_s0 = inlined_call_operand.vmem [shape: f32[2,9,9,16], index: 0, kind: input, shape index: {}]   ;;  %s1261_s1 = inlined_call_operand.vmem [shape: bf16[64,16], index: 1, kind: input, shape index: {}]   ;;  %s1262_s2 = inlined_call_operand.vmem [shape: f32[2,64,16], index: 2, kind: output, shape index: {0}]   ;;  %s1263_s3 = inlined_call_operand.vmem [shape: f32[2,1,16], index: 3, kind: output, shape index: {1}]   ;;  %s1264_s4 = inlined_call_operand.vmem [shape: f32[2,1,16], index: 4, kind: output, shape index: {2}]  }
   0x1   :  { %s1052_s17 = smov 0  }
   0x2 LB: > { %s27_s18 = sadd.s32 1, %s1014_s16  ;;  %p905_p0 = scmp.ge.s32.totalorder %s1018_s17, 1  ;;  %s1018_s17 = sphi %s1052_s17, %s15_s17   ;;  %s1014_s16 = sphi %s1050_s16, %s1268_s16   ;;  %s1010_s15 = sphi %s1048_s15, %s1267_s15  }
   0x3   : > { %p29_p1 = scmp.ge.s32.totalorder %s27_s18, 2  ;;  %p194_p2 = scmp.lt.s32.totalorder %s1018_s17, 3 }
   0x5   : > { %s1270_s18 = smov (%p29_p1, %s27_s18), 0  ;;  %p195_p3 = pnand %p905_p0, %p194_p2 }
   0x6   : > { %p239_p4 = scmp.lt.s32.totalorder (!%p195_p3), %s1010_s15, 1  ;;  %s1020_s23 = smov (!%p195_p3), 32  }
   0x7   : > { %198 = sbr.rel (%p195_p3) target bundleno = 346 (0x15a), region = 28  ;;  %s1021_s24 = smov (!%p195_p3), 16  }
   0x8   : > { %s1022_s25 = smov (!%p195_p3), 48  }
   0xc   : > { %s1272_s15 = smov (!%p239_p4, %s1010_s15), 1  ;;  %vm309_vm0 = vsmask.f32 3328  ;;  %vm310_vm1 = vsmask.f32 7440  ;;  %v950_v44 = vld [vmem:[%s1261_s1 + $0x10] sm:$0xff] }
   0xd   : > { %s968_s19 = smul.u32 144, %s1272_s15  ;;  %vm1104_vm2 = vmor %vm309_vm0, %vm310_vm1  ;;  %vm505_vm3 = vcmask 130048   ;;  %vm527_vm4 = vcmask 392192   ;;  %vm518_vm5 = vcmask 261120   ;;  %vm564_vm6 = vcmask 519168   ;;  %s947_s8 = sshll.u32 %s1272_s15, 6 }
   0xe   : > { %vm633_vm7 = vcmask 523264   ;;  %s1209_s11 = scalar_lea.vmem %s1262_s2, %s947_s8  ;;  %s261_s14 = scalar_lea.vmem %s1263_s3, %s1272_s15  ;;  %vm705_vm8 = vcmask 122880  }
   0xf   : > { %s1072_s22 = scalar_lea.vmem %s1260_s0, %s968_s19  ;;  %s267_s21 = scalar_lea.vmem %s1264_s4, %s1272_s15 }
  0x10   : > { %v279_v0 = vld [vmem:[%s1072_s22 + $0x30] sm:$0xff]  ;;  %v281_v1 = vld [vmem:[%s1072_s22 + $0x40] sm:$0xff]  ;;  %v282_v8 = vld [vmem:[%s1072_s22 + $0x48] sm:$0x1] }
  0x11   : > { %v275_v2 = vld [vmem:[%s1072_s22 + $0x10] sm:$0xff]  ;;  %v297_v3 = vpack.c.bf16 %v279_v0, %v279_v0  ;;  %v1077_v4 = vpack.c.bf16 %v281_v1, %v281_v1  ;;  %v277_v5 = vld [vmem:[%s1072_s22 + $0x20] sm:$0xff]  ;;  %v300_v11 = vpack.c.bf16 %v282_v8, %v282_v8  ;;  %v284_v25 = vld [vmem:[%s1072_s22 + $0x58] sm:$0x1] }
  0x12   : > { %v293_v6 = vpack.c.bf16 %v275_v2, %v275_v2  ;;  %v273_v7 = vld [vmem:[%s1072_s22] sm:$0xff]  ;;  %v295_v9 = vpack.c.bf16 %v277_v5, %v277_v5  ;;  %v283_v24 = vld [vmem:[%s1072_s22 + $0x50] sm:$0xff]  ;;  %v302_v35 = vpack.c.bf16 %v284_v25, %v284_v25  ;;  %v274_v38 = vld [vmem:[%s1072_s22 + $0x8] sm:$0x1] }
  0x13   : > { %v291_v10 = vpack.c.bf16 %v273_v7, %v273_v7  ;;  %v369_v12 = vshrl.u32 %v1077_v4, 16  ;;  %v372_v13 = vshll.u32 %v1077_v4, 16  ;;  %v449_v14 = vunpack.c.l.b16 %v297_v3  ;;  %v276_v39 = vld [vmem:[%s1072_s22 + $0x18] sm:$0x1]  ;;  %v285_v57 = vld [vmem:[%s1072_s22 + $0x60] sm:$0xff]  ;;  %v287_v58 = vld [vmem:[%s1072_s22 + $0x70] sm:$0xff] }
  0x14   : > { %v450_v15 = vunpack.c.l.b16 %v1077_v4  ;;  %v355_v16 = vshrl.u32 %v297_v3, 16  ;;  %v358_v17 = vshll.u32 %v297_v3, 16  ;;  %v341_v18 = vshrl.u32 %v295_v9, 16 }
  0x15   : > { %v344_v19 = vshll.u32 %v295_v9, 16  ;;  %v371_v20 = vrot.slane %v369_v12, 4  ;;  %v374_v21 = vrot.slane %v372_v13, 5  ;;  %v447_v23 = vunpack.c.l.b16 %v293_v6 }
  0x16   : > { %v481_v22 = vpack.c.b16 %v450_v15, %v449_v14  ;;  %v1089_v26 = vrot.slane %v355_v16, 4  ;;  %v1091_v27 = vrot.slane %v358_v17, 5  ;;  %v1093_v28 = vrot.slane %v341_v18, 4 }
  0x17   : > { %v1095_v29 = vrot.slane %v344_v19, 5  ;;  %v448_v30 = vunpack.c.l.b16 %v295_v9  ;;  %v327_v31 = vshrl.u32 %v293_v6, 16  ;;  %v330_v32 = vshll.u32 %v293_v6, 16 }
  0x18   : > { %486 = vrot.lane.b32.xlu1 %v481_v22, %s1020_s23  ;;  %v446_v33 = vunpack.c.l.b16 %v291_v10  ;;  %v301_v34 = vpack.c.bf16 %v283_v24, %v283_v24  ;;  %v375_v36 = vor.u32 %v374_v21, %v371_v20  ;;  %v378_v37 = vshll.u32 %v300_v11, 16  ;;  %v278_v21 = vld [vmem:[%s1072_s22 + $0x28] sm:$0x1] }
  0x19   : > { %v1100_v40 = vpack.c.b16 %v449_v14, %v448_v30  ;;  %v480_v41 = vpack.c.b16 %v448_v30, %v447_v23  ;;  %v329_v42 = vrot.slane %v327_v31, 4  ;;  %v332_v43 = vrot.slane %v330_v32, 5  ;;  %v286_v22 = vld [vmem:[%s1072_s22 + $0x68] sm:$0x1]  ;;  %v280_v31 = vld [vmem:[%s1072_s22 + $0x38] sm:$0x1] }
  0x1a   : > { %v1108_v45 = vpack.c.b16 %v447_v23, %v446_v33  ;;  %v376_v46 = vrot.slane %v375_v36, 4  ;;  %v380_v47 = vrot.slane %v378_v37, 5  ;;  %v383_v48 = vshrl.u32 %v301_v34, 16 }
  0x1b   : > { %484 = vrot.lane.b32.xlu0 %v480_v41, %s1020_s23  ;;  %v386_v49 = vshll.u32 %v301_v34, 16  ;;  %v392_v50 = vshll.u32 %v302_v35, 16  ;;  %v292_v51 = vpack.c.bf16 %v274_v38, %v274_v38  ;;  %v294_v52 = vpack.c.bf16 %v276_v39, %v276_v39 }
  0x1c   : > { %v1113_v53 = vsel %vm1104_vm2, %v376_v46, %v380_v47  ;;  %v385_v54 = vrot.slane %v383_v48, 4  ;;  %v313_v55 = vshrl.u32 %v291_v10, 16  ;;  %v316_v56 = vshll.u32 %v291_v10, 16 }
  0x1d   : > { %v388_v59 = vrot.slane %v386_v49, 5  ;;  %v394_v60 = vrot.slane %v392_v50, 5  ;;  %v462_v61 = vunpack.c.l.b16 %v1113_v53  ;;  %v322_v62 = vshll.u32 %v292_v51, 16  ;;  %v289_v50 = vld [vmem:[%s1072_s22 + $0x80] sm:$0xff]  ;;  %v290_v51 = vld [vmem:[%s1072_s22 + $0x88] sm:$0x1] }
  0x1e   : > { %v315_v63 = vrot.slane %v313_v55, 4  ;;  %v318_v0 = vrot.slane %v316_v56, 5  ;;  %v333_v1 = vor.u32 %v332_v43, %v329_v42  ;;  %v336_v2 = vshll.u32 %v294_v52, 16  ;;  %v288_v43 = vld [vmem:[%s1072_s22 + $0x78] sm:$0x1]  ;;  %v949_v53 = vld [vmem:[%s1261_s1 + $0x8] sm:$0xff] }
  0x1f   : > { %v389_v3 = vor.u32 %v388_v59, %v385_v54  ;;  %v324_v5 = vrot.slane %v322_v62, 5  ;;  %v303_v6 = vpack.c.bf16 %v285_v57, %v285_v57  ;;  %v1118_v7 = vpack.c.bf16 %v287_v58, %v287_v58 }
  0x20   : > { %v319_v8 = vor.u32 %v318_v0, %v315_v63  ;;  %v334_v9 = vrot.slane %v333_v1, 4  ;;  %v338_v10 = vrot.slane %v336_v2, 5  ;;  %v451_v11 = vunpack.c.l.b16 %v301_v34 }
  0x21   : > { %v390_v12 = vrot.slane %v389_v3, 4  ;;  %v397_v13 = vshrl.u32 %v303_v6, 16  ;;  %v400_v14 = vshll.u32 %v303_v6, 16  ;;  %v452_v16 = vunpack.c.l.b16 %v303_v6 }
  0x22   : > { %v320_v17 = vrot.slane %v319_v8, 4  ;;  %v339_v18 = vsel %vm1104_vm2, %v334_v9, %v338_v10  ;;  %v453_v19 = vunpack.c.l.b16 %v1118_v7  ;;  %v1125_v20 = vpack.c.b16 %v451_v11, %v450_v15 }
  0x23   : > { %v395_v23 = vsel %vm1104_vm2, %v390_v12, %v394_v60  ;;  %v459_v24 = vunpack.c.l.b16 %v339_v18  ;;  %v399_v25 = vrot.slane %v397_v13, 4  ;;  %v402_v30 = vrot.slane %v400_v14, 5 }
  0x24   : > { %v463_v32 = vunpack.c.l.b16 %v395_v23  ;;  %v325_v33 = vsel %vm1104_vm2, %v320_v17, %v324_v5  ;;  %v1136_v34 = vpack.c.b16 %v453_v19, %v452_v16  ;;  %v482_v4 = vpack.c.b16 %v452_v16, %v451_v11 }
  0x25   : > { %v458_v15 = vunpack.c.l.b16 %v325_v33  ;;  %v296_v35 = vpack.c.bf16 %v278_v21, %v278_v21  ;;  %v347_v36 = vor.u32 %v1095_v29, %v1093_v28  ;;  %v304_v37 = vpack.c.bf16 %v286_v22, %v286_v22 }
  0x26   : > { %v468_v38 = vpack.c.b16 %v463_v32, %v462_v61  ;;  %488 = vrot.lane.b32.xlu2 %v482_v4, %s1020_s23  ;;  %v403_v39 = vor.u32 %v402_v30, %v399_v25  ;;  %v298_v41 = vpack.c.bf16 %v280_v31, %v280_v31  ;;  %v361_v42 = vor.u32 %v1091_v27, %v1089_v26 }
  0x27   : > { %v466_v46 = vpack.c.b16 %v459_v24, %v458_v15  ;;  %v348_v47 = vrot.slane %v347_v36, 4  ;;  %v350_v48 = vshll.u32 %v296_v35, 16  ;;  %v406_v49 = vshll.u32 %v304_v37, 16 }
  0x28   : > { %474 = vrot.lane.b32.xlu1 %v468_v38, %s1021_s24  ;;  %v404_v28 = vrot.slane %v403_v39, 4  ;;  %v362_v29 = vrot.slane %v361_v42, 4  ;;  %v364_v52 = vshll.u32 %v298_v41, 16  ;;  %v306_v56 = vpack.c.bf16 %v288_v43, %v288_v43 }
  0x29   : > { %470 = vrot.lane.b32.xlu0 %v466_v46, %s1021_s24  ;;  %v352_v54 = vrot.slane %v350_v48, 5  ;;  %v408_v55 = vrot.slane %v406_v49, 5  ;;  %v411_v26 = vshrl.u32 %v1118_v7, 16  ;;  %v307_v57 = vpack.c.bf16 %v289_v50, %v289_v50 }
  0x2a   : > { %v366_v27 = vrot.slane %v364_v52, 5  ;;  %v414_v58 = vshll.u32 %v1118_v7, 16  ;;  %v308_v59 = vpack.c.bf16 %v290_v51, %v290_v51  ;;  %v420_v0 = vshll.u32 %v306_v56, 16  ;;  %v951_v7 = vld [vmem:[%s1261_s1 + $0x18] sm:$0xff] }
  0x2b   : > { %v353_v60 = vsel %vm1104_vm2, %v348_v47, %v352_v54  ;;  %v409_v62 = vsel %vm1104_vm2, %v404_v28, %v408_v55  ;;  %v413_v63 = vrot.slane %v411_v26, 4  ;;  %v425_v8 = vshrl.u32 %v307_v57, 16  ;;  %650 = vmatpush.bf16.msra.mxu0 %v951_v7  ;;  %957 = vmatpush.bf16.msra.mxu2 %v951_v7 }
  0x2c   : > { %v460_v1 = vunpack.c.l.b16 %v353_v60  ;;  %v464_v2 = vunpack.c.l.b16 %v409_v62  ;;  %v367_v3 = vsel %vm1104_vm2, %v362_v29, %v366_v27  ;;  %v416_v6 = vrot.slane %v414_v58, 5  ;;  %956 = vmatpush.bf16.msra.mxu1 %v951_v7  ;;  %958 = vmatpush.bf16.msra.mxu3 %v951_v7 }
  0x2d   : > { %v461_v5 = vunpack.c.l.b16 %v367_v3  ;;  %v428_v11 = vshll.u32 %v307_v57, 16  ;;  %v434_v12 = vshll.u32 %v308_v59, 16  ;;  %v422_v16 = vrot.slane %v420_v0, 5 }
  0x2e   : > { %v493_v9 = vpack.c.b16 %v460_v1, %v459_v24  ;;  %v495_v10 = vpack.c.b16 %v464_v2, %v463_v32  ;;  %v417_v14 = vor.u32 %v416_v6, %v413_v63  ;;  %v427_v17 = vrot.slane %v425_v8, 4 }
  0x2f   : > { %v467_v13 = vpack.c.b16 %v461_v5, %v460_v1  ;;  %v479_v18 = vunpack.c.l.b16 %v307_v57  ;;  %v430_v21 = vrot.slane %v428_v11, 5  ;;  %v436_v25 = vrot.slane %v434_v12, 5  ;;  %651 = vmatpush.bf16.msra.mxu0 %v950_v44  ;;  %960 = vmatpush.bf16.msra.mxu2 %v950_v44 }
  0x30   : > { %497 = vrot.lane.b32.xlu1 %v493_v9, %s1022_s25  ;;  %v418_v22 = vrot.slane %v417_v14, 4  ;;  %v494_v33 = vpack.c.b16 %v462_v61, %v461_v5  ;;  %959 = vmatpush.bf16.msra.mxu1 %v950_v44 }
  0x31   : > { %501 = vrot.lane.b32.xlu0 %v495_v10, %s1022_s25  ;;  %472 = vrot.lane.b32.xlu2 %v467_v13, %s1021_s24  ;;  %v431_v23 = vor.u32 %v430_v21, %v427_v17  ;;  %v483_v30 = vpack.c.b16 %v479_v18, %v453_v19  ;;  %v948_v19 = vld [vmem:[%s1261_s1] sm:$0xff] }
  0x32   : > { %v423_v24 = vsel %vm1104_vm2, %v418_v22, %v422_v16  ;;  %961 = vmatpush.bf16.msra.mxu3 %v950_v44 }
  0x33   : > { %v465_v31 = vunpack.c.l.b16 %v423_v24  ;;  %v432_v32 = vrot.slane %v431_v23, 4  ;;  %652 = vmatpush.bf16.msra.mxu0 %v949_v53  ;;  %963 = vmatpush.bf16.msra.mxu2 %v949_v53 }
  0x34   : > { %962 = vmatpush.bf16.msra.mxu1 %v949_v53 }
  0x35   : > { %v469_v4 = vpack.c.b16 %v465_v31, %v464_v2  ;;  %v437_v15 = vsel %vm1104_vm2, %v432_v32, %v436_v25 }
  0x36   : > { %v492_v35 = vunpack.c.l.b16 %v437_v15  ;;  %964 = vmatpush.bf16.msra.mxu3 %v949_v53 }
  0x37   : > { %653 = vmatpush.bf16.msra.mxu0 %v948_v19  ;;  %966 = vmatpush.bf16.msra.mxu2 %v948_v19 }
  0x38   : > { %490 = vrot.lane.b32.xlu1 %v483_v30, %s1020_s23  ;;  %v496_v36 = vpack.c.b16 %v492_v35, %v465_v31  ;;  %965 = vmatpush.bf16.msra.mxu1 %v948_v19 }
  0x39   : > { %499 = vrot.lane.b32.xlu0 %v494_v33, %s1022_s25  ;;  %476 = vrot.lane.b32.xlu2 %v469_v4, %s1021_s24 }
  0x3a   : > { %967 = vmatpush.bf16.msra.mxu3 %v948_v19 }
  0x41   : > { %503 = vrot.lane.b32.xlu2 %v496_v36, %s1022_s25 }
  0x80   : > { %v489_v61 = vpop.permute.xlu2 %488 }
  0x8a   : > { %v487_v37 = vpop.permute.xlu1 %486 }
  0x8b   : > { %v473_v39 = vpop.permute.xlu2 %472 }
  0x8c   : > { %v511_v57 = vsel %vm505_vm3, %v1100_v40, %v473_v39 }
  0x8d   : > { %v485_v38 = vpop.permute.xlu0 %484  ;;  %v522_v63 = vsel %vm518_vm5, %v511_v57, %v487_v37 }
  0x93   : > { %v477_v46 = vpop.permute.xlu2 %476 }
  0x94   : > { %v517_v59 = vsel %vm505_vm3, %v1136_v34, %v477_v46 }
  0x9a   : > { %v475_v41 = vpop.permute.xlu1 %474 }
  0x9b   : > { %v471_v42 = vpop.permute.xlu0 %470  ;;  %v514_v47 = vsel %vm505_vm3, %v1125_v20, %v475_v41  ;;  %v504_v58 = vpop.permute.xlu2 %503 }
  0x9c   : > { %v508_v43 = vsel %vm505_vm3, %v1108_v45, %v471_v42  ;;  %v524_v51 = vsel %vm518_vm5, %v514_v47, %v489_v61 }
  0x9d   : > { %v520_v49 = vsel %vm518_vm5, %v508_v43, %v485_v38 }
  0xa2   : > { %v498_v48 = vpop.permute.xlu1 %497 }
  0xa3   : > { %v529_v50 = vsel %vm527_vm4, %v520_v49, %v498_v48  ;;  %v502_v28 = vpop.permute.xlu0 %501 }
  0xa4   : > { %v540_v29 = vunpack.c.l.b16 %v529_v50  ;;  %v541_v52 = vunpack.c.h.b16 %v529_v50  ;;  %v533_v54 = vsel %vm527_vm4, %v524_v51, %v502_v28 }
  0xa5   : > { %v544_v45 = vunpack.c.l.b16 %v533_v54  ;;  %v545_v55 = vunpack.c.h.b16 %v533_v54 }
  0xa6   : > { %v548_v56 = vpack.c.b16 %v540_v29, %v540_v29  ;;  %v549_v26 = vpack.c.b16 %v541_v52, %v541_v52 }
  0xa7   : > { %v552_v20 = vpack.c.b16 %v544_v45, %v544_v45  ;;  %v553_v27 = vpack.c.b16 %v545_v55, %v545_v55 }
  0xa8   : > { %565 = vst.msk [vmem:[#allocation2] sm:$0xf] %vm564_vm6, %v548_v56 }
  0xa9   : > { %566 = vst.msk [vmem:[#allocation2 + $0x4] sm:$0xf] %vm564_vm6, %v549_v26 }
  0xaa   : > { %569 = vst.msk [vmem:[#allocation2 + $0x10] sm:$0xf] %vm564_vm6, %v552_v20  ;;  %v491_v60 = vpop.permute.xlu1 %490 }
  0xab   : > { %570 = vst.msk [vmem:[#allocation2 + $0x14] sm:$0xf] %vm564_vm6, %v553_v27  ;;  %v526_v62 = vsel %vm518_vm5, %v517_v59, %v491_v60  ;;  %v500_v0 = vpop.permute.xlu0 %499 }
  0xac   : > { %v531_v40 = vsel %vm527_vm4, %v522_v63, %v500_v0  ;;  %v535_v1 = vsel %vm527_vm4, %v526_v62, %v504_v58 }
  0xad   : > { %v542_v2 = vunpack.c.l.b16 %v531_v40  ;;  %v543_v3 = vunpack.c.h.b16 %v531_v40  ;;  %v546_v5 = vunpack.c.l.b16 %v535_v1  ;;  %v547_v6 = vunpack.c.h.b16 %v535_v1 }
  0xaf   : > { %v550_v8 = vpack.c.b16 %v542_v2, %v542_v2  ;;  %v551_v9 = vpack.c.b16 %v543_v3, %v543_v3  ;;  %v554_v34 = vpack.c.b16 %v546_v5, %v546_v5  ;;  %v555_v10 = vpack.c.b16 %v547_v6, %v547_v6 }
  0xb0   : > { %v952_v11 = vld [vmem:[#allocation2] sm:$0xff] }
  0xb1   : > { %567 = vst.msk [vmem:[#allocation2 + $0x8] sm:$0xf] %vm564_vm6, %v550_v8  ;;  %941 = vmatmul.msk.bf16.vlgmr.msra.gmra.mxu0 %vm633_vm7, %v952_v11 }
  0xb2   : > { %568 = vst.msk [vmem:[#allocation2 + $0xc] sm:$0xf] %vm564_vm6, %v551_v9  ;;  %v954_v12 = vld [vmem:[#allocation2 + $0x10] sm:$0xff] }
  0xb3   : > { %571 = vst.msk [vmem:[#allocation2 + $0x18] sm:$0xf] %vm564_vm6, %v554_v34  ;;  %943 = vmatmul.msk.bf16.vlgmr.msra.gmra.mxu2 %vm633_vm7, %v954_v12 }
  0xb4   : > { %572 = vst.msk [vmem:[#allocation2 + $0x1c] sm:$0xf] %vm564_vm6, %v555_v10 }
  0xb9   : > { %v953_v13 = vld [vmem:[#allocation2 + $0x8] sm:$0xff] }
  0xba   : > { %942 = vmatmul.msk.bf16.vlgmr.msra.gmra.mxu1 %vm633_vm7, %v953_v13 }
  0xbb   : > { %v955_v14 = vld [vmem:[#allocation2 + $0x18] sm:$0xff] }
  0xbc   : > { %944 = vmatmul.msk.bf16.vlgmr.msra.gmra.mxu3 %vm633_vm7, %v955_v14 }
 0x12e   : > { %v655_v16 = vpop.f32.mrf.mxu0 }
 0x12f   : > { %676 = vst.msk [vmem:[%s1209_s11] sm:$0xff] %vm505_vm3, %v655_v16  ;;  %v707_v23 = vmul.f32 %v655_v16, %v655_v16  ;;  %v684_v24 = vsel %vm505_vm3, %v655_v16, 0.0 }
 0x131   : > { %v715_v32 = vsel %vm505_vm3, %v707_v23, 0.0 }
 0x136   : > { %v665_v17 = vpop.f32.mrf.mxu2  ;;  %v657_v18 = vpop.f32.mrf.mxu0 }
 0x137   : > { %680 = vst.msk [vmem:[%s1209_s11 + $0x20] sm:$0xff] %vm505_vm3, %v665_v17  ;;  %v708_v21 = vmul.f32 %v657_v18, %v657_v18  ;;  %v660_v22 = vpop.f32.mrf.mxu1  ;;  %v685_v25 = vsel %vm505_vm3, %v657_v18, 0.0  ;;  %v711_v53 = vmul.f32 %v665_v17, %v665_v17  ;;  %v691_v41 = vsel %vm505_vm3, %v665_v17, 0.0 }
 0x138   : > { %677 = vst.msk [vmem:[%s1209_s11 + $0x8] sm:$0xff] %vm505_vm3, %v657_v18  ;;  %v686_v31 = vadd.f32 %v685_v25, %v684_v24  ;;  %v709_v33 = vmul.f32 %v660_v22, %v660_v22  ;;  %v687_v15 = vsel %vm505_vm3, %v660_v22, 0.0 }
 0x139   : > { %678 = vst.msk [vmem:[%s1209_s11 + $0x10] sm:$0xff] %vm505_vm3, %v660_v22  ;;  %v716_v30 = vsel %vm505_vm3, %v708_v21, 0.0  ;;  %v722_v48 = vsel %vm505_vm3, %v711_v53, 0.0 }
 0x13a   : > { %v717_v4 = vadd.f32 %v716_v30, %v715_v32  ;;  %v688_v36 = vadd.f32 %v687_v15, %v686_v31  ;;  %v718_v61 = vsel %vm505_vm3, %v709_v33, 0.0 }
 0x13c   : > { %v719_v38 = vadd.f32 %v718_v61, %v717_v4 }
 0x13e   : > { %v667_v35 = vpop.f32.mrf.mxu2 }
 0x13f   : > { %681 = vst.msk [vmem:[%s1209_s11 + $0x28] sm:$0xff] %vm505_vm3, %v667_v35  ;;  %v670_v7 = vpop.f32.mrf.mxu3  ;;  %v662_v44 = vpop.f32.mrf.mxu1  ;;  %v712_v42 = vmul.f32 %v667_v35, %v667_v35  ;;  %v693_v49 = vsel %vm505_vm3, %v667_v35, 0.0 }
 0x140   : > { %682 = vst.msk [vmem:[%s1209_s11 + $0x30] sm:$0xff] %vm505_vm3, %v670_v7  ;;  %v689_v19 = vsel %vm505_vm3, %v662_v44, 0.0  ;;  %v710_v37 = vmul.f32 %v662_v44, %v662_v44  ;;  %v713_v50 = vmul.f32 %v670_v7, %v670_v7  ;;  %v695_v52 = vsel %vm505_vm3, %v670_v7, 0.0 }
 0x141   : > { %679 = vst.msk [vmem:[%s1209_s11 + $0x18] sm:$0xff] %vm505_vm3, %v662_v44  ;;  %v690_v39 = vadd.f32 %v689_v19, %v688_v36  ;;  %v724_v29 = vsel %vm505_vm3, %v712_v42, 0.0 }
 0x142   : > { %v720_v43 = vsel %vm505_vm3, %v710_v37, 0.0  ;;  %v726_v56 = vsel %vm505_vm3, %v713_v50, 0.0 }
 0x143   : > { %v692_v46 = vadd.f32 %v691_v41, %v690_v39  ;;  %v721_v47 = vadd.f32 %v720_v43, %v719_v38 }
 0x145   : > { %v723_v51 = vadd.f32 %v722_v48, %v721_v47  ;;  %v694_v28 = vadd.f32 %v693_v49, %v692_v46 }
 0x147   : > { %v672_v54 = vpop.f32.mrf.mxu3  ;;  %v696_v45 = vadd.f32 %v695_v52, %v694_v28  ;;  %v725_v55 = vadd.f32 %v724_v29, %v723_v51 }
 0x148   : > { %683 = vst.msk [vmem:[%s1209_s11 + $0x38] sm:$0xff] %vm505_vm3, %v672_v54  ;;  %v697_v26 = vsel %vm505_vm3, %v672_v54, 0.0  ;;  %v714_v20 = vmul.f32 %v672_v54, %v672_v54 }
 0x149   : > { %v698_v27 = vadd.f32 %v697_v26, %v696_v45  ;;  %v727_v57 = vadd.f32 %v726_v56, %v725_v55 }
 0x14a   : > { %v728_v58 = vsel %vm505_vm3, %v714_v20, 0.0 }
 0x14b   : > { %v699_v59 = vrot.slane %v698_v27, 4  ;;  %v729_v60 = vadd.f32 %v728_v58, %v727_v57 }
 0x14d   : > { %v700_v62 = vadd.f32 %v699_v59, %v698_v27  ;;  %v730_v63 = vrot.slane %v729_v60, 4 }
 0x14f   : > { %v701_v0 = vrot.slane %v700_v62, 2  ;;  %v731_v40 = vadd.f32 %v730_v63, %v729_v60 }
 0x151   : > { %v702_v1 = vadd.f32 %v701_v0, %v700_v62  ;;  %v732_v2 = vrot.slane %v731_v40, 2 }
 0x153   : > { %v703_v3 = vrot.slane %v702_v1, 1  ;;  %v733_v5 = vadd.f32 %v732_v2, %v731_v40 }
 0x155   : > { %v704_v6 = vadd.f32 %v703_v3, %v702_v1  ;;  %v734_v8 = vrot.slane %v733_v5, 1 }
 0x157   : > { %706 = vst.msk [vmem:[%s261_s14] sm:$0x1] %vm705_vm8, %v704_v6  ;;  %v735_v9 = vadd.f32 %v734_v8, %v733_v5 }
 0x159   : > { %736 = vst.msk [vmem:[%s267_s21] sm:$0x1] %vm705_vm8, %v735_v9 }
 0x15a PF: > { %s15_s17 = sadd.s32 1, %s1018_s17   ;;  %s1267_s15 = smov %s1014_s16 }
 0x15b   : > { %p12_p5 = scmp.ge.s32.totalorder %s15_s17, 4   ;;  %s1268_s16 = smov %s1270_s18 }
 0x15d   :  { %14 = sbr.rel (!%p12_p5) target bundleno = 2 (0x2), region = 89 }

// kernel: _lambda_.5
= control target key start
LH: loop header
LB: loop body
LE: loop exit
PB: predicated region body
PF: predicated region fallthrough
CT: control target
= control target key end

     0   :  { %s112_s0 = inlined_call_operand.vmem [shape: f32[8,128], index: 0, kind: input, shape index: {}]   ;;  %s113_s1 = inlined_call_operand.vmem [shape: f32[1,128], index: 1, kind: input, shape index: {}]   ;;  %s114_s2 = inlined_call_operand.vmem [shape: f32[1,128], index: 2, kind: input, shape index: {}]   ;;  %s115_s3 = inlined_call_operand.vmem [shape: f32[8,128], index: 3, kind: input, shape index: {}]   ;;  %s116_s4 = inlined_call_operand.vmem [shape: f32[1,128], index: 4, kind: input, shape index: {}]   ;;  %s117_s5 = inlined_call_operand.vmem [shape: f32[1,128], index: 5, kind: input, shape index: {}]   ;;  %s118_s6 = inlined_call_operand.vmem [shape: f32[8,128], index: 6, kind: output, shape index: {}]  }
   0x1   :  { %v23_v0 = vld [vmem:[%s112_s0] sm:$0xff] }
   0x2   :  { %v52_v1 = vld [vmem:[%s113_s1] ss:$0 sm:$0xff] }
   0x3   :  { %v53_v2 = vld [vmem:[%s114_s2] ss:$0 sm:$0xff]  ;;  %v28_v4 = vmul.f32 %v52_v1, %v23_v0 }
   0x4   :  { %v34_v3 = vld [vmem:[%s115_s3] sm:$0xff] }
   0x5   :  { %v54_v5 = vld [vmem:[%s116_s4] ss:$0 sm:$0xff]  ;;  %v33_v7 = vadd.f32 %v53_v2, %v28_v4 }
   0x6   :  { %v55_v6 = vld [vmem:[%s117_s5] ss:$0 sm:$0xff]  ;;  %v39_v8 = vmul.f32 %v54_v5, %v34_v3 }
   0x8   :  { %v44_v9 = vadd.f32 %v55_v6, %v39_v8 }
   0xa   :  { %v45_v10 = vadd.f32 %v44_v9, %v33_v7 }
   0xc   :  { %v46_v11 = vmax.f32 %v45_v10, 0.0 }
   0xe   :  { %47 = vst [vmem:[%s118_s6] sm:$0xff] %v46_v11 }

// kernel: _lambda_.4
= control target key start
LH: loop header
LB: loop body
LE: loop exit
PB: predicated region body
PF: predicated region fallthrough
CT: control target
= control target key end

     0   :  { %s1432_s21 = smov 0   ;;  %s1434_s22 = smov 0   ;;  %s1890_s0 = inlined_call_operand.vmem [shape: f32[2,10,10,8], index: 0, kind: input, shape index: {}]   ;;  %s1891_s1 = inlined_call_operand.vmem [shape: bf16[72,8], index: 1, kind: input, shape index: {}]   ;;  %s1892_s2 = inlined_call_operand.vmem [shape: f32[1,1,8], index: 2, kind: input, shape index: {}]   ;;  %s1893_s3 = inlined_call_operand.vmem [shape: f32[1,1,8], index: 3, kind: input, shape index: {}]   ;;  %s1894_s4 = inlined_call_operand.vmem [shape: f32[2,64,8], index: 4, kind: output, shape index: {0}]   ;;  %s1895_s5 = inlined_call_operand.vmem [shape: f32[2,1,8], index: 5, kind: output, shape index: {1}]   ;;  %s1896_s6 = inlined_call_operand.vmem [shape: f32[2,1,8], index: 6, kind: output, shape index: {2}]  }
   0x1   :  { %s1436_s23 = smov 0  }
   0x2 LB: > { %s29_s24 = sadd.s32 1, %s1381_s22  ;;  %p1250_p0 = scmp.ge.s32.totalorder %s1385_s23, 1  ;;  %s1385_s23 = sphi %s1436_s23, %s17_s23   ;;  %s1381_s22 = sphi %s1434_s22, %s1902_s22   ;;  %s1377_s21 = sphi %s1432_s21, %s1901_s21  }
   0x3   : > { %p31_p1 = scmp.ge.s32.totalorder %s29_s24, 2  ;;  %p244_p2 = scmp.lt.s32.totalorder %s1385_s23, 3 }
   0x5   : > { %s1904_s24 = smov (%p31_p1, %s29_s24), 0  ;;  %p245_p3 = pnand %p1250_p0, %p244_p2 }
   0x6   : > { %p293_p4 = scmp.lt.s32.totalorder (!%p245_p3), %s1377_s21, 1  ;;  %s1389_s9 = smov (!%p245_p3), 24  }
   0x7   : > { %248 = sbr.rel (%p245_p3) target bundleno = 413 (0x19d), region = 36  ;;  %s1390_s10 = smov (!%p245_p3), 48  }
   0x8   : > { %s1391_s11 = smov (!%p245_p3), 16   ;;  %s1392_s12 = smov (!%p245_p3), 40  }
   0x9   : > { %s1393_s13 = smov (!%p245_p3), 8   ;;  %s1394_s14 = smov (!%p245_p3), 32  }
   0xa   : > { %s1395_s15 = smov (!%p245_p3), 56   ;;  %s1396_s16 = smov (!%p245_p3), 64  }
   0xc   : > { %v415_v0 = vlaneseq  ;;  %s1906_s21 = smov (!%p293_p4, %s1377_s21), 1  ;;  %vm601_vm0 = vcmask 1042432   ;;  %vm602_vm1 = vcmask 1046532   ;;  %v1387_v2 = vmov 0.0|0.0   ;;  %v1462_v6 = vld [vmem:[%s1892_s2] ss:$0 sm:$0xff] }
   0xd   : > { %v1254_v3 = vrot.slane %v1387_v2, 9  ;;  %vm1454_vm2 = vmor %vm601_vm0, %vm602_vm1  ;;  %v606_v5 = vrot.slane %v1387_v2, 5  ;;  %s1326_s25 = smul.u32 160, %s1906_s21  ;;  %v1388_v8 = vmov 0   ;;  %v1479_v12 = vld [vmem:[%s1893_s3] ss:$0 sm:$0xff]  ;;  %v1485_v16 = vunpack.c.l.b16 %v1387_v2 }
   0xe   : > { %v1452_v1 = vshrl.u32 %v415_v0, 7  ;;  %v476_v9 = vrot.slane %v1388_v8, 4  ;;  %v1467_v10 = vrot.slane %v1388_v8, 5  ;;  %vm470_vm5 = vsmask.f32 3328  ;;  %s1302_s7 = sshll.u32 %s1906_s21, 6 }
   0xf   : > { %v607_v11 = vsel %vm1454_vm2, %v1254_v3, %v606_v5  ;;  %s1474_s30 = scalar_lea.vmem %s1890_s0, %s1326_s25  ;;  %vm471_vm6 = vsmask.f32 7440  ;;  %vm987_vm8 = vcmask 1043456   ;;  %vm797_vm9 = vcmask 64512  }
  0x10   : > { %v1465_v7 = vadd.s32 8, %v1452_v1  ;;  %v480_v13 = vor.u32 %v1467_v10, %v476_v9  ;;  %v329_v14 = vld [vmem:[%s1474_s30 + $0x10] sm:$0xff]  ;;  %v331_v15 = vld [vmem:[%s1474_s30 + $0x20] sm:$0xff]  ;;  %vm418_vm3 = vcmp.ge.s32.totalorder %v1452_v1, 1  ;;  %v330_v21 = vld [vmem:[%s1474_s30 + $0x18] sm:$0x3]  ;;  %v1493_v22 = vunpack.c.l.b16 %v607_v11 }
  0x11   : > { %v333_v17 = vld [vmem:[%s1474_s30 + $0x30] sm:$0xff]  ;;  %v353_v18 = vmul.f32 %v1462_v6, %v329_v14  ;;  %v355_v19 = vmul.f32 %v1462_v6, %v331_v15  ;;  %v339_v24 = vld [vmem:[%s1474_s30 + $0x60] sm:$0xff]  ;;  %v354_v25 = vmul.f32 %v1462_v6, %v330_v21  ;;  %v336_v29 = vld [vmem:[%s1474_s30 + $0x48] sm:$0x3]  ;;  %vm810_vm10 = vcmask 130048  }
  0x12   : > { %vm425_vm4 = vcmp.le.s32.totalorder %v1465_v7, 8  ;;  %v357_v20 = vmul.f32 %v1462_v6, %v333_v17  ;;  %v337_v23 = vld [vmem:[%s1474_s30 + $0x50] sm:$0xff]  ;;  %v363_v27 = vmul.f32 %v1462_v6, %v339_v24  ;;  %v335_v28 = vld [vmem:[%s1474_s30 + $0x40] sm:$0xff]  ;;  %v338_v30 = vld [vmem:[%s1474_s30 + $0x58] sm:$0x3]  ;;  %v1503_v31 = vrot.slane %v480_v13, 4 }
  0x13   : > { %v361_v26 = vmul.f32 %v1462_v6, %v337_v23  ;;  %v377_v32 = vadd.f32 %v1479_v12, %v353_v18  ;;  %v379_v33 = vadd.f32 %v1479_v12, %v355_v19  ;;  %v359_v35 = vmul.f32 %v1462_v6, %v335_v28  ;;  %v332_v19 = vld [vmem:[%s1474_s30 + $0x28] sm:$0x3]  ;;  %vm1618_vm7 = vmor %vm470_vm5, %vm471_vm6 }
  0x14   : > { %v381_v34 = vadd.f32 %v1479_v12, %v357_v20  ;;  %v378_v36 = vadd.f32 %v1479_v12, %v354_v25  ;;  %v387_v38 = vadd.f32 %v1479_v12, %v363_v27  ;;  %v360_v39 = vmul.f32 %v1462_v6, %v336_v29  ;;  %v334_v20 = vld [vmem:[%s1474_s30 + $0x38] sm:$0x3] }
  0x15   : > { %v385_v37 = vadd.f32 %v1479_v12, %v361_v26  ;;  %v397_v40 = vmax.f32 %v377_v32, 0.0  ;;  %v399_v41 = vmax.f32 %v379_v33, 0.0  ;;  %v362_v43 = vmul.f32 %v1462_v6, %v338_v30 }
  0x16   : > { %v401_v42 = vmax.f32 %v381_v34, 0.0  ;;  %v398_v44 = vmax.f32 %v378_v36, 0.0  ;;  %v407_v46 = vmax.f32 %v387_v38, 0.0  ;;  %v383_v47 = vadd.f32 %v1479_v12, %v359_v35 }
  0x17   : > { %v405_v45 = vmax.f32 %v385_v37, 0.0  ;;  %v432_v48 = vsel %vm418_vm3, %v397_v40, 0.0  ;;  %v434_v49 = vsel %vm418_vm3, %v399_v41, 0.0  ;;  %v384_v51 = vadd.f32 %v1479_v12, %v360_v39 }
  0x18   : > { %v436_v50 = vsel %vm418_vm3, %v401_v42, 0.0  ;;  %v1522_v52 = vpack.c.bf16 %v432_v48, %v432_v48  ;;  %v1524_v53 = vpack.c.bf16 %v434_v49, %v434_v49  ;;  %v433_v55 = vsel %vm425_vm4, %v398_v44, 0.0 }
  0x19   : > { %v1526_v54 = vpack.c.bf16 %v436_v50, %v436_v50  ;;  %v1530_v56 = vpack.c.bf16 %v433_v55, %v433_v55  ;;  %v440_v57 = vsel %vm418_vm3, %v405_v45, 0.0  ;;  %v442_v58 = vsel %vm418_vm3, %v407_v46, 0.0 }
  0x1a   : > { %v386_v59 = vadd.f32 %v1479_v12, %v362_v43  ;;  %v677_v60 = vunpack.c.l.b16 %v1522_v52  ;;  %v678_v61 = vunpack.c.l.b16 %v1524_v53  ;;  %v1255_v63 = vrot.slane %v1522_v52, 9 }
  0x1b   : > { %v679_v62 = vunpack.c.l.b16 %v1526_v54  ;;  %v610_v0 = vrot.slane %v1530_v56, 5  ;;  %v1542_v2 = vpack.c.bf16 %v440_v57, %v440_v57  ;;  %v1544_v3 = vpack.c.bf16 %v442_v58, %v442_v58 }
  0x1c   : > { %v403_v5 = vmax.f32 %v383_v47, 0.0  ;;  %v729_v8 = vpack.c.b16 %v678_v61, %v677_v60  ;;  %v1547_v9 = vpack.c.b16 %v677_v60, %v1485_v16  ;;  %v404_v13 = vmax.f32 %v384_v51, 0.0 }
  0x1d   : > { %v1551_v11 = vpack.c.b16 %v679_v62, %v678_v61  ;;  %v1555_v14 = vsel %vm1454_vm2, %v1255_v63, %v610_v0  ;;  %v681_v15 = vunpack.c.l.b16 %v1542_v2  ;;  %v682_v17 = vunpack.c.l.b16 %v1544_v3 }
  0x1e   : > { %v406_v18 = vmax.f32 %v386_v59, 0.0  ;;  %733 = vrot.lane.b32.xlu1 %v729_v8, %s1389_s9  ;;  %v709_v21 = vunpack.c.l.b16 %v1555_v14  ;;  %v438_v23 = vsel %vm418_vm3, %v403_v5, 0.0  ;;  %v439_v24 = vsel %vm425_vm4, %v404_v13, 0.0 }
  0x1f   : > { %769 = vrot.lane.b32.xlu2 %v1551_v11, %s1390_s10  ;;  %v1259_v25 = vrot.slane %v1542_v2, 9  ;;  %v731_v26 = vpack.c.b16 %v682_v17, %v681_v15  ;;  %v1576_v28 = vpack.c.bf16 %v438_v23, %v438_v23  ;;  %v459_v29 = vpack.c.bf16 %v439_v24, %v439_v24 }
  0x20   : > { %v441_v27 = vsel %vm425_vm4, %v406_v18, 0.0  ;;  %v716_v30 = vpack.c.b16 %v709_v21, %v1493_v22  ;;  %v356_v33 = vmul.f32 %v1462_v6, %v332_v19  ;;  %v358_v34 = vmul.f32 %v1462_v6, %v334_v20 }
  0x21   : > { %v461_v32 = vpack.c.bf16 %v441_v27, %v441_v27  ;;  %v1258_v35 = vrot.slane %v1576_v28, 9  ;;  %v622_v36 = vrot.slane %v459_v29, 5  ;;  %v1256_v37 = vrot.slane %v1524_v53, 9 }
  0x22   : > { %v1257_v38 = vrot.slane %v1526_v54, 9  ;;  %720 = vrot.lane.b32.xlu0 %v716_v30, %s1391_s11  ;;  %v380_v40 = vadd.f32 %v1479_v12, %v356_v33  ;;  %v382_v41 = vadd.f32 %v1479_v12, %v358_v34  ;;  %v530_v42 = vshrl.u32 %v1576_v28, 16 }
  0x23   : > { %v626_v39 = vrot.slane %v461_v32, 5  ;;  %v1592_v43 = vsel %vm1454_vm2, %v1258_v35, %v622_v36  ;;  %v533_v44 = vshll.u32 %v1576_v28, 16  ;;  %v539_v45 = vshll.u32 %v459_v29, 16  ;;  %v340_v35 = vld [vmem:[%s1474_s30 + $0x68] sm:$0x3] }
  0x24   : > { %v544_v46 = vshrl.u32 %v1542_v2, 16  ;;  %v712_v48 = vunpack.c.l.b16 %v1592_v43  ;;  %v400_v49 = vmax.f32 %v380_v40, 0.0  ;;  %v402_v50 = vmax.f32 %v382_v41, 0.0 }
  0x25   : > { %v1598_v47 = vsel %vm1454_vm2, %v1259_v25, %v626_v39  ;;  %v532_v55 = vrot.slane %v530_v42, 4  ;;  %v535_v57 = vrot.slane %v533_v44, 5  ;;  %v541_v58 = vrot.slane %v539_v45, 5 }
  0x26   : > { %v713_v51 = vunpack.c.l.b16 %v1598_v47  ;;  %737 = vrot.lane.b32.xlu1 %v731_v26, %s1389_s9  ;;  %v435_v59 = vsel %vm425_vm4, %v400_v49, 0.0  ;;  %v437_v60 = vsel %vm425_vm4, %v402_v50, 0.0  ;;  %v546_v61 = vrot.slane %v544_v46, 4 }
  0x27   : > { %v547_v63 = vshll.u32 %v1542_v2, 16  ;;  %v455_v5 = vpack.c.bf16 %v435_v59, %v435_v59  ;;  %v1614_v8 = vpack.c.bf16 %v437_v60, %v437_v60  ;;  %v536_v18 = vor.u32 %v535_v57, %v532_v55 }
  0x28   : > { %v1612_v0 = vpack.c.b16 %v713_v51, %v712_v48  ;;  %v553_v20 = vshll.u32 %v461_v32, 16  ;;  %v486_v23 = vsel %vm1618_vm7, %v1503_v31, %v1467_v10  ;;  %v488_v24 = vshrl.u32 %v1522_v52, 16 }
  0x29   : > { %v549_v19 = vrot.slane %v547_v63, 5  ;;  %v614_v25 = vrot.slane %v455_v5, 5  ;;  %v618_v26 = vrot.slane %v1614_v8, 5  ;;  %v537_v27 = vrot.slane %v536_v18, 4 }
  0x2a   : > { %724 = vrot.lane.b32.xlu2 %v1612_v0, %s1391_s11  ;;  %v491_v29 = vshll.u32 %v1522_v52, 16  ;;  %v555_v33 = vrot.slane %v553_v20, 5  ;;  %v490_v34 = vrot.slane %v488_v24, 4  ;;  %v497_v32 = vshll.u32 %v1530_v56, 16 }
  0x2b   : > { %v550_v30 = vor.u32 %v549_v19, %v546_v61  ;;  %v615_v10 = vsel %vm1454_vm2, %v1256_v37, %v614_v25  ;;  %v1637_v31 = vsel %vm1454_vm2, %v1257_v38, %v618_v26  ;;  %v542_v36 = vsel %vm1618_vm7, %v537_v27, %v541_v58 }
  0x2c   : > { %v493_v39 = vrot.slane %v491_v29, 5  ;;  %v710_v40 = vunpack.c.l.b16 %v615_v10  ;;  %v711_v52 = vunpack.c.l.b16 %v1637_v31  ;;  %v1642_v42 = vunpack.c.l.b16 %v542_v36 }
  0x2d   : > { %v551_v41 = vrot.slane %v550_v30, 4  ;;  %v499_v56 = vrot.slane %v497_v32, 5  ;;  %v1644_v45 = vunpack.c.l.b16 %v486_v23  ;;  %v364_v37 = vmul.f32 %v1462_v6, %v340_v35  ;;  %v341_v35 = vld [vmem:[%s1474_s30 + $0x70] sm:$0xff] }
  0x2e   : > { %v494_v44 = vor.u32 %v493_v39, %v490_v34  ;;  %v1649_v38 = vpack.c.b16 %v711_v52, %v710_v40  ;;  %v755_v49 = vpack.c.b16 %v710_v40, %v709_v21  ;;  %v558_v50 = vshrl.u32 %v1544_v3, 16  ;;  %v342_v39 = vld [vmem:[%s1474_s30 + $0x78] sm:$0x3]  ;;  %v343_v40 = vld [vmem:[%s1474_s30 + $0x80] sm:$0xff] }
  0x2f   : > { %v556_v46 = vsel %vm1618_vm7, %v551_v41, %v555_v33  ;;  %v388_v58 = vadd.f32 %v1479_v12, %v364_v37  ;;  %v561_v59 = vshll.u32 %v1544_v3, 16  ;;  %v502_v61 = vshrl.u32 %v1524_v53, 16 }
  0x30   : > { %v1656_v55 = vunpack.c.l.b16 %v556_v46  ;;  %v495_v57 = vrot.slane %v494_v44, 4  ;;  %722 = vrot.lane.b32.xlu0 %v1649_v38, %s1391_s11  ;;  %v560_v60 = vrot.slane %v558_v50, 4  ;;  %v505_v63 = vshll.u32 %v1524_v53, 16 }
  0x31   : > { %v511_v18 = vshll.u32 %v455_v5, 16  ;;  %v408_v19 = vmax.f32 %v388_v58, 0.0  ;;  %v563_v20 = vrot.slane %v561_v59, 5  ;;  %v504_v24 = vrot.slane %v502_v61, 4 }
  0x32   : > { %v1666_v14 = vpack.c.b16 %v1656_v55, %v1642_v42  ;;  %759 = vrot.lane.b32.xlu2 %v755_v49, %s1392_s12  ;;  %v500_v21 = vsel %vm1618_vm7, %v495_v57, %v499_v56  ;;  %v507_v25 = vrot.slane %v505_v63, 5  ;;  %v516_v27 = vshrl.u32 %v1526_v54, 16 }
  0x33   : > { %v689_v23 = vunpack.c.l.b16 %v500_v21  ;;  %v513_v53 = vrot.slane %v511_v18, 5  ;;  %v443_v5 = vsel %vm425_vm4, %v408_v19, 0.0  ;;  %v564_v26 = vor.u32 %v563_v20, %v560_v60 }
  0x34   : > { %704 = vrot.lane.b32.xlu1 %v1666_v14, %s1393_s13  ;;  %v519_v29 = vshll.u32 %v1526_v54, 16  ;;  %v463_v33 = vpack.c.bf16 %v443_v5, %v443_v5  ;;  %v508_v34 = vor.u32 %v507_v25, %v504_v24  ;;  %v525_v32 = vshll.u32 %v1614_v8, 16  ;;  %v344_v25 = vld [vmem:[%s1474_s30 + $0x88] sm:$0x3] }
  0x35   : > { %v696_v30 = vpack.c.b16 %v689_v23, %v1644_v45  ;;  %v518_v10 = vrot.slane %v516_v27, 4  ;;  %v565_v41 = vrot.slane %v564_v26, 4  ;;  %v1260_v37 = vrot.slane %v1544_v3, 9 }
  0x36   : > { %v521_v36 = vrot.slane %v519_v29, 5  ;;  %v567_v44 = vshll.u32 %v463_v33, 16  ;;  %v509_v56 = vrot.slane %v508_v34, 4  ;;  %v527_v49 = vrot.slane %v525_v32, 5 }
  0x37   : > { %v630_v50 = vrot.slane %v463_v33, 5  ;;  %v365_v57 = vmul.f32 %v1462_v6, %v341_v35  ;;  %v366_v59 = vmul.f32 %v1462_v6, %v342_v39  ;;  %v367_v60 = vmul.f32 %v1462_v6, %v343_v40 }
  0x38   : > { %v522_v46 = vor.u32 %v521_v36, %v518_v10  ;;  %700 = vrot.lane.b32.xlu0 %v696_v30, %s1393_s13  ;;  %v569_v58 = vrot.slane %v567_v44, 5  ;;  %v514_v8 = vsel %vm1618_vm7, %v509_v56, %v513_v53  ;;  %v368_v10 = vmul.f32 %v1462_v6, %v344_v25 }
  0x39   : > { %v690_v61 = vunpack.c.l.b16 %v514_v8  ;;  %v389_v18 = vadd.f32 %v1479_v12, %v365_v57  ;;  %v631_v19 = vsel %vm1454_vm2, %v1260_v37, %v630_v50  ;;  %v390_v20 = vadd.f32 %v1479_v12, %v366_v59 }
  0x3a   : > { %v523_v63 = vrot.slane %v522_v46, 4  ;;  %v570_v21 = vsel %vm1618_vm7, %v565_v41, %v569_v58  ;;  %v391_v24 = vadd.f32 %v1479_v12, %v367_v60  ;;  %v714_v32 = vunpack.c.l.b16 %v631_v19 }
  0x3b   : > { %v694_v53 = vunpack.c.l.b16 %v570_v21  ;;  %v742_v5 = vpack.c.b16 %v690_v61, %v689_v23  ;;  %v409_v27 = vmax.f32 %v389_v18, 0.0  ;;  %v410_v30 = vmax.f32 %v390_v20, 0.0 }
  0x3c   : > { %v528_v26 = vsel %vm1618_vm7, %v523_v63, %v527_v49  ;;  %v411_v33 = vmax.f32 %v391_v24, 0.0  ;;  %v680_v40 = vunpack.c.l.b16 %v1576_v28  ;;  %v392_v44 = vadd.f32 %v1479_v12, %v368_v10 }
  0x3d   : > { %v691_v29 = vunpack.c.l.b16 %v528_v26  ;;  %v744_v34 = vpack.c.b16 %v694_v53, %v1656_v55  ;;  %746 = vrot.lane.b32.xlu2 %v742_v5, %s1394_s14  ;;  %v444_v35 = vsel %vm418_vm3, %v409_v27, 0.0  ;;  %v445_v23 = vsel %vm425_vm4, %v410_v30, 0.0 }
  0x3e   : > { %v464_v39 = vpack.c.bf16 %v444_v35, %v444_v35  ;;  %v465_v41 = vpack.c.bf16 %v445_v23, %v445_v23  ;;  %v446_v55 = vsel %vm418_vm3, %v411_v33, 0.0  ;;  %v757_v49 = vpack.c.b16 %v714_v32, %v713_v51 }
  0x3f   : > { %v697_v36 = vpack.c.b16 %v691_v29, %v690_v61  ;;  %750 = vrot.lane.b32.xlu1 %v744_v34, %s1394_s14  ;;  %v466_v46 = vpack.c.bf16 %v446_v55, %v446_v55  ;;  %v412_v58 = vmax.f32 %v392_v44, 0.0  ;;  %v730_v1 = vpack.c.b16 %v680_v40, %v679_v62 }
  0x40   : > { %v572_v56 = vshrl.u32 %v464_v39, 16  ;;  %v575_v37 = vshll.u32 %v464_v39, 16  ;;  %v1261_v6 = vrot.slane %v464_v39, 9  ;;  %v581_v50 = vshll.u32 %v465_v41, 16 }
  0x41   : > { %702 = vrot.lane.b32.xlu0 %v697_v36, %s1393_s13  ;;  %v634_v57 = vrot.slane %v465_v41, 5  ;;  %v637_v60 = vshrl.u32 %v466_v46, 16  ;;  %v447_v12 = vsel %vm425_vm4, %v412_v58, 0.0  ;;  %v640_v51 = vshll.u32 %v466_v46, 16 }
  0x42   : > { %v574_v8 = vrot.slane %v572_v56, 4  ;;  %v577_v59 = vrot.slane %v575_v37, 5  ;;  %v583_v63 = vrot.slane %v581_v50, 5  ;;  %v467_v21 = vpack.c.bf16 %v447_v12, %v447_v12  ;;  %v1305_v37 = vld [vmem:[%s1891_s1 + $0x10] sm:$0xff] }
  0x43   : > { %v635_v47 = vsel %vm1454_vm2, %v1261_v6, %v634_v57  ;;  %v639_v19 = vrot.slane %v637_v60, 4  ;;  %v642_v20 = vrot.slane %v640_v51, 5  ;;  %v743_v24 = vpack.c.b16 %v1642_v42, %v691_v29  ;;  %v1303_v57 = vld [vmem:[%s1891_s1] sm:$0xff] }
  0x44   : > { %v578_v61 = vor.u32 %v577_v59, %v574_v8  ;;  %v715_v54 = vunpack.c.l.b16 %v635_v47  ;;  %v646_v5 = vshll.u32 %v467_v21, 16  ;;  %v683_v30 = vunpack.c.l.b16 %v464_v39 }
  0x45   : > { %763 = vrot.lane.b32.xlu2 %v757_v49, %s1392_s12  ;;  %v643_v25 = vor.u32 %v642_v20, %v639_v19  ;;  %v728_v33 = vunpack.c.l.b16 %v466_v46  ;;  %v1262_v41 = vrot.slane %v466_v46, 9  ;;  %v654_v42 = vrot.slane %v467_v21, 5  ;;  %v1304_v46 = vld [vmem:[%s1891_s1 + $0x8] sm:$0xff] }
  0x46   : > { %v579_v18 = vrot.slane %v578_v61, 4  ;;  %v719_v27 = vpack.c.b16 %v715_v54, %v714_v32  ;;  %v648_v35 = vrot.slane %v646_v5, 5  ;;  %v1738_v32 = vpack.c.b16 %v683_v30, %v682_v17 }
  0x47   : > { %735 = vrot.lane.b32.xlu1 %v730_v1, %s1389_s9  ;;  %v644_v34 = vrot.slane %v643_v25, 4  ;;  %v732_v10 = vpack.c.b16 %v728_v33, %v683_v30  ;;  %v655_v29 = vsel %vm1454_vm2, %v1262_v41, %v654_v42  ;;  %v756_v4 = vpack.c.b16 %v712_v48, %v711_v52 }
  0x48   : > { %v584_v62 = vsel %vm1618_vm7, %v579_v18, %v583_v63  ;;  %v754_v13 = vunpack.c.l.b16 %v655_v29  ;;  %v768_v3 = vpack.c.b16 %v1485_v16, %v728_v33  ;;  %vm819_vm11 = vcmask 195584  }
  0x49   : > { %v695_v7 = vunpack.c.l.b16 %v584_v62  ;;  %v649_v23 = vsel %vm1618_vm7, %v644_v34, %v648_v35  ;;  %vm828_vm12 = vcmask 261120   ;;  %vm837_vm13 = vcmask 326656  }
  0x4a   : > { %v788_v55 = vpack.c.b16 %v1493_v22, %v754_v13  ;;  %v1754_v22 = vpack.c.b16 %v681_v15, %v680_v40  ;;  %v1306_v40 = vld [vmem:[%s1891_s1 + $0x18] sm:$0xff]  ;;  %vm846_vm14 = vcmask 392192   ;;  %vm855_vm15 = vcmask 457728  }
  0x4b   : > { %v699_v26 = vpack.c.b16 %v695_v7, %v694_v53  ;;  %v741_v53 = vunpack.c.l.b16 %v649_v23  ;;  %vm864_vm0 = vcmask 523264   ;;  %vm901_vm1 = vcmask 584704  }
  0x4c   : > { %vm974_vm2 = vcmask 588800   ;;  %vm1050_vm3 = vcmask 57344  }
  0x4d   : > { %706 = vrot.lane.b32.xlu0 %v699_v26, %s1393_s13  ;;  %748 = vrot.lane.b32.xlu2 %v743_v24, %s1394_s14  ;;  %v745_v39 = vpack.c.b16 %v741_v53, %v695_v7  ;;  %v778_v17 = vpack.c.b16 %v1644_v45, %v741_v53  ;;  %s315_s13 = scalar_lea.vmem %s1895_s5, %s1906_s21 }
  0x4f   : > { %726 = vrot.lane.b32.xlu1 %v719_v27, %s1391_s11 }
  0x55   : > { %779 = vrot.lane.b32.xlu0 %v697_v36, %s1395_s15  ;;  %739 = vrot.lane.b32.xlu2 %v732_v10, %s1389_s9 }
  0x57   : > { %789 = vrot.lane.b32.xlu1 %v1649_v38, %s1396_s16  ;;  %v758_v38 = vpack.c.b16 %v754_v13, %v715_v54 }
  0x5d   : > { %773 = vrot.lane.b32.xlu0 %v1738_v32, %s1390_s10  ;;  %752 = vrot.lane.b32.xlu2 %v745_v39, %s1394_s14 }
  0x5f   : > { %783 = vrot.lane.b32.xlu1 %v699_v26, %s1395_s15 }
  0x65   : > { %761 = vrot.lane.b32.xlu0 %v756_v4, %s1392_s12  ;;  %765 = vrot.lane.b32.xlu2 %v758_v38, %s1392_s12 }
  0x67   : > { %793 = vrot.lane.b32.xlu1 %v719_v27, %s1396_s16 }
  0x6d   : > { %771 = vrot.lane.b32.xlu0 %v1754_v22, %s1390_s10  ;;  %791 = vrot.lane.b32.xlu2 %v1612_v0, %s1396_s16  ;;  %v918_v0 = vld [vmem:[%s1891_s1 + $0x20] sm:$0xf] }
  0x6e   : > { %v964_v52 = vunpack.c.l.b16 %v918_v0 }
  0x6f   : > { %775 = vrot.lane.b32.xlu1 %v768_v3, %s1390_s10  ;;  %s1839_s10 = scalar_lea.vmem %s1894_s4, %s1302_s7 }
  0x75   : > { %781 = vrot.lane.b32.xlu0 %v1666_v14, %s1395_s15  ;;  %v969_v14 = vpack.c.b16 %v964_v52, %v964_v52 }
  0x77   : > { %795 = vrot.lane.b32.xlu1 %v788_v55, %s1396_s16  ;;  %v989_v45 = vsel %vm987_vm8, %v969_v14, 0  ;;  %s321_s16 = scalar_lea.vmem %s1896_s6, %s1906_s21 }
  0x78   : > { %994 = vmatpush.bf16.msra.mxu0 %v989_v45  ;;  %1312 = vmatpush.bf16.msra.mxu2 %v989_v45 }
  0x79   : > { %v770_v28 = vpop.permute.xlu2 %769  ;;  %1311 = vmatpush.bf16.msra.mxu1 %v989_v45  ;;  %1313 = vmatpush.bf16.msra.mxu3 %v989_v45 }
  0x7c   : > { %995 = vmatpush.bf16.msra.mxu0 %v1306_v40  ;;  %1315 = vmatpush.bf16.msra.mxu2 %v1306_v40 }
  0x7d   : > { %785 = vrot.lane.b32.xlu0 %v778_v17, %s1395_s15  ;;  %1314 = vmatpush.bf16.msra.mxu1 %v1306_v40 }
  0x7e   : > { %1316 = vmatpush.bf16.msra.mxu3 %v1306_v40 }
  0x80   : > { %996 = vmatpush.bf16.msra.mxu0 %v1305_v37  ;;  %1318 = vmatpush.bf16.msra.mxu2 %v1305_v37 }
  0x81   : > { %1317 = vmatpush.bf16.msra.mxu1 %v1305_v37 }
  0x82   : > { %1319 = vmatpush.bf16.msra.mxu3 %v1305_v37 }
  0x84   : > { %v1763_v2 = vpop.permute.xlu2 %724  ;;  %997 = vmatpush.bf16.msra.mxu0 %v1304_v46  ;;  %1321 = vmatpush.bf16.msra.mxu2 %v1304_v46 }
  0x85   : > { %1320 = vmatpush.bf16.msra.mxu1 %v1304_v46 }
  0x86   : > { %1322 = vmatpush.bf16.msra.mxu3 %v1304_v46 }
  0x88   : > { %998 = vmatpush.bf16.msra.mxu0 %v1303_v57  ;;  %1324 = vmatpush.bf16.msra.mxu2 %v1303_v57 }
  0x89   : > { %1323 = vmatpush.bf16.msra.mxu1 %v1303_v57 }
  0x8a   : > { %1325 = vmatpush.bf16.msra.mxu3 %v1303_v57 }
  0x8c   : > { %v760_v16 = vpop.permute.xlu2 %759 }
  0x90   : > { %v734_v43 = vpop.permute.xlu1 %733 }
  0x94   : > { %v721_v15 = vpop.permute.xlu0 %720 }
  0x97   : > { %v747_v56 = vpop.permute.xlu2 %746 }
  0x98   : > { %v1765_v48 = vpop.permute.xlu1 %737 }
  0x9f   : > { %v764_v50 = vpop.permute.xlu2 %763 }
  0xa2   : > { %v1767_v31 = vpop.permute.xlu0 %722 }
  0xa6   : > { %v705_v36 = vpop.permute.xlu1 %704 }
  0xa7   : > { %v749_v12 = vpop.permute.xlu2 %748  ;;  %v806_v7 = vsel %vm797_vm9, %v1754_v22, %v705_v36 }
  0xa8   : > { %v816_v26 = vsel %vm810_vm10, %v806_v7, %v1763_v2 }
  0xa9   : > { %v825_v30 = vsel %vm819_vm11, %v816_v26, %v1765_v48 }
  0xaa   : > { %v701_v44 = vpop.permute.xlu0 %700 }
  0xab   : > { %v800_v58 = vsel %vm797_vm9, %v1547_v9, %v701_v44 }
  0xac   : > { %v812_v59 = vsel %vm810_vm10, %v800_v58, %v721_v15 }
  0xad   : > { %v821_v60 = vsel %vm819_vm11, %v812_v59, %v734_v43 }
  0xae   : > { %v830_v63 = vsel %vm828_vm12, %v821_v60, %v747_v56 }
  0xaf   : > { %v839_v47 = vsel %vm837_vm13, %v830_v63, %v760_v16  ;;  %v740_v19 = vpop.permute.xlu2 %739 }
  0xb0   : > { %v848_v51 = vsel %vm846_vm14, %v839_v47, %v770_v28 }
  0xb1   : > { %v751_v6 = vpop.permute.xlu1 %750 }
  0xb2   : > { %v834_v33 = vsel %vm828_vm12, %v825_v30, %v751_v6 }
  0xb3   : > { %v703_v49 = vpop.permute.xlu0 %702  ;;  %v843_v35 = vsel %vm837_vm13, %v834_v33, %v764_v50 }
  0xb4   : > { %v803_v38 = vsel %vm797_vm9, %v1551_v11, %v703_v49 }
  0xb5   : > { %v814_v17 = vsel %vm810_vm10, %v803_v38, %v1767_v31 }
  0xb7   : > { %v753_v34 = vpop.permute.xlu2 %752 }
  0xb9   : > { %v736_v8 = vpop.permute.xlu1 %735 }
  0xba   : > { %v823_v28 = vsel %vm819_vm11, %v814_v17, %v736_v8 }
  0xbb   : > { %v832_v15 = vsel %vm828_vm12, %v823_v28, %v749_v12 }
  0xbf   : > { %v707_v1 = vpop.permute.xlu0 %706  ;;  %v766_v22 = vpop.permute.xlu2 %765 }
  0xc0   : > { %v809_v43 = vsel %vm797_vm9, %v1738_v32, %v707_v1 }
  0xc1   : > { %v727_v61 = vpop.permute.xlu1 %726 }
  0xc2   : > { %v818_v2 = vsel %vm810_vm10, %v809_v43, %v727_v61 }
  0xc3   : > { %v827_v36 = vsel %vm819_vm11, %v818_v2, %v740_v19 }
  0xc4   : > { %v836_v44 = vsel %vm828_vm12, %v827_v36, %v753_v34 }
  0xc5   : > { %v845_v6 = vsel %vm837_vm13, %v836_v44, %v766_v22 }
  0xc7   : > { %v780_v9 = vpop.permute.xlu0 %779  ;;  %v792_v16 = vpop.permute.xlu2 %791 }
  0xc8   : > { %v857_v18 = vsel %vm855_vm15, %v848_v51, %v780_v9 }
  0xc9   : > { %v790_v21 = vpop.permute.xlu1 %789 }
  0xca   : > { %v866_v54 = vsel %vm864_vm0, %v857_v18, %v790_v21 }
  0xcb   : > { %v877_v20 = vunpack.c.l.b16 %v866_v54  ;;  %v878_v62 = vunpack.c.h.b16 %v866_v54 }
  0xcd   : > { %v885_v24 = vpack.c.b16 %v877_v20, %v877_v20  ;;  %v886_v25 = vpack.c.b16 %v878_v62, %v878_v62 }
  0xcf   : > { %902 = vst.msk [vmem:[#allocation2] sm:$0xf] %vm901_vm1, %v885_v24  ;;  %v774_v5 = vpop.permute.xlu0 %773 }
  0xd0   : > { %903 = vst.msk [vmem:[#allocation2 + $0x4] sm:$0xf] %vm901_vm1, %v886_v25  ;;  %v852_v41 = vsel %vm846_vm14, %v843_v35, %v774_v5 }
  0xd1   : > { %v784_v27 = vpop.permute.xlu1 %783 }
  0xd2   : > { %v861_v42 = vsel %vm855_vm15, %v852_v41, %v784_v27 }
  0xd7   : > { %v762_v10 = vpop.permute.xlu0 %761  ;;  %v1307_v23 = vld [vmem:[#allocation2] sm:$0xff] }
  0xd8   : > { %1296 = vmatmul.msk.bf16.vlgmr.msra.gmra.mxu0 %vm974_vm2, %v1307_v23  ;;  %v841_v11 = vsel %vm837_vm13, %v832_v15, %v762_v10 }
  0xd9   : > { %v794_v53 = vpop.permute.xlu1 %793 }
  0xda   : > { %v870_v29 = vsel %vm864_vm0, %v861_v42, %v794_v53 }
  0xdb   : > { %v881_v39 = vunpack.c.l.b16 %v870_v29  ;;  %v882_v13 = vunpack.c.h.b16 %v870_v29 }
  0xdd   : > { %v889_v55 = vpack.c.b16 %v881_v39, %v881_v39  ;;  %v890_v4 = vpack.c.b16 %v882_v13, %v882_v13 }
  0xdf   : > { %906 = vst.msk [vmem:[#allocation2 + $0x10] sm:$0xf] %vm901_vm1, %v889_v55  ;;  %v772_v3 = vpop.permute.xlu0 %771 }
  0xe0   : > { %907 = vst.msk [vmem:[#allocation2 + $0x14] sm:$0xf] %vm901_vm1, %v890_v4  ;;  %v850_v0 = vsel %vm846_vm14, %v841_v11, %v772_v3 }
  0xe1   : > { %v776_v48 = vpop.permute.xlu1 %775 }
  0xe2   : > { %v854_v49 = vsel %vm846_vm14, %v845_v6, %v776_v48 }
  0xe7   : > { %v782_v52 = vpop.permute.xlu0 %781  ;;  %v1309_v14 = vld [vmem:[#allocation2 + $0x10] sm:$0xff] }
  0xe8   : > { %v859_v31 = vsel %vm855_vm15, %v850_v0, %v782_v52  ;;  %1298 = vmatmul.msk.bf16.vlgmr.msra.gmra.mxu2 %vm974_vm2, %v1309_v14 }
  0xe9   : > { %v868_v45 = vsel %vm864_vm0, %v859_v31, %v792_v16  ;;  %v796_v46 = vpop.permute.xlu1 %795 }
  0xea   : > { %v879_v32 = vunpack.c.l.b16 %v868_v45  ;;  %v880_v40 = vunpack.c.h.b16 %v868_v45 }
  0xec   : > { %v887_v56 = vpack.c.b16 %v879_v32, %v879_v32  ;;  %v888_v37 = vpack.c.b16 %v880_v40, %v880_v40 }
  0xee   : > { %904 = vst.msk [vmem:[#allocation2 + $0x8] sm:$0xf] %vm901_vm1, %v887_v56 }
  0xef   : > { %905 = vst.msk [vmem:[#allocation2 + $0xc] sm:$0xf] %vm901_vm1, %v888_v37  ;;  %v786_v50 = vpop.permute.xlu0 %785 }
  0xf0   : > { %v863_v57 = vsel %vm855_vm15, %v854_v49, %v786_v50 }
  0xf1   : > { %v872_v58 = vsel %vm864_vm0, %v863_v57, %v796_v46 }
  0xf2   : > { %v883_v8 = vunpack.c.l.b16 %v872_v58  ;;  %v884_v59 = vunpack.c.h.b16 %v872_v58 }
  0xf4   : > { %v891_v60 = vpack.c.b16 %v883_v8, %v883_v8  ;;  %v892_v1 = vpack.c.b16 %v884_v59, %v884_v59 }
  0xf6   : > { %908 = vst.msk [vmem:[#allocation2 + $0x18] sm:$0xf] %vm901_vm1, %v891_v60  ;;  %v1308_v12 = vld [vmem:[#allocation2 + $0x8] sm:$0xff] }
  0xf7   : > { %909 = vst.msk [vmem:[#allocation2 + $0x1c] sm:$0xf] %vm901_vm1, %v892_v1  ;;  %1297 = vmatmul.msk.bf16.vlgmr.msra.gmra.mxu1 %vm974_vm2, %v1308_v12 }
  0xfe   : > { %v1310_v61 = vld [vmem:[#allocation2 + $0x18] sm:$0xff] }
  0xff   : > { %1299 = vmatmul.msk.bf16.vlgmr.msra.gmra.mxu3 %vm974_vm2, %v1310_v61 }
 0x155   : > { %v1000_v63 = vpop.f32.mrf.mxu0 }
 0x156   : > { %1021 = vst.msk [vmem:[%s1839_s10] sm:$0xff] %vm797_vm9, %v1000_v63  ;;  %v1052_v19 = vmul.f32 %v1000_v63, %v1000_v63  ;;  %v1029_v62 = vsel %vm797_vm9, %v1000_v63, 0.0 }
 0x158   : > { %v1060_v5 = vsel %vm797_vm9, %v1052_v19, 0.0 }
 0x15d   : > { %v1002_v47 = vpop.f32.mrf.mxu0 }
 0x15e   : > { %1022 = vst.msk [vmem:[%s1839_s10 + $0x8] sm:$0xff] %vm797_vm9, %v1002_v47  ;;  %v1053_v21 = vmul.f32 %v1002_v47, %v1002_v47  ;;  %v1030_v54 = vsel %vm797_vm9, %v1002_v47, 0.0 }
 0x15f   : > { %v1031_v25 = vadd.f32 %v1030_v54, %v1029_v62 }
 0x160   : > { %v1061_v7 = vsel %vm797_vm9, %v1053_v21, 0.0 }
 0x161   : > { %v1062_v27 = vadd.f32 %v1061_v7, %v1060_v5 }
 0x16b   : > { %v1010_v9 = vpop.f32.mrf.mxu2 }
 0x16c   : > { %1025 = vst.msk [vmem:[%s1839_s10 + $0x20] sm:$0xff] %vm797_vm9, %v1010_v9  ;;  %v1056_v41 = vmul.f32 %v1010_v9, %v1010_v9  ;;  %v1036_v29 = vsel %vm797_vm9, %v1010_v9, 0.0 }
 0x16e   : > { %v1067_v55 = vsel %vm797_vm9, %v1056_v41, 0.0 }
 0x173   : > { %v1012_v51 = vpop.f32.mrf.mxu2 }
 0x174   : > { %v1005_v18 = vpop.f32.mrf.mxu1  ;;  %1026 = vst.msk [vmem:[%s1839_s10 + $0x28] sm:$0xff] %vm797_vm9, %v1012_v51  ;;  %v1057_v4 = vmul.f32 %v1012_v51, %v1012_v51  ;;  %v1038_v22 = vsel %vm797_vm9, %v1012_v51, 0.0 }
 0x175   : > { %1023 = vst.msk [vmem:[%s1839_s10 + $0x10] sm:$0xff] %vm797_vm9, %v1005_v18  ;;  %v1054_v20 = vmul.f32 %v1005_v18, %v1005_v18  ;;  %v1032_v24 = vsel %vm797_vm9, %v1005_v18, 0.0 }
 0x176   : > { %v1033_v30 = vadd.f32 %v1032_v24, %v1031_v25  ;;  %v1069_v28 = vsel %vm797_vm9, %v1057_v4, 0.0 }
 0x177   : > { %v1063_v26 = vsel %vm797_vm9, %v1054_v20, 0.0 }
 0x178   : > { %v1064_v10 = vadd.f32 %v1063_v26, %v1062_v27 }
 0x17c   : > { %v1007_v33 = vpop.f32.mrf.mxu1 }
 0x17d   : > { %1024 = vst.msk [vmem:[%s1839_s10 + $0x18] sm:$0xff] %vm797_vm9, %v1007_v33  ;;  %v1034_v34 = vsel %vm797_vm9, %v1007_v33, 0.0  ;;  %v1055_v35 = vmul.f32 %v1007_v33, %v1007_v33 }
 0x17e   : > { %v1035_v23 = vadd.f32 %v1034_v34, %v1033_v30 }
 0x17f   : > { %v1065_v42 = vsel %vm797_vm9, %v1055_v35, 0.0 }
 0x180   : > { %v1066_v53 = vadd.f32 %v1065_v42, %v1064_v10  ;;  %v1037_v39 = vadd.f32 %v1036_v29, %v1035_v23 }
 0x182   : > { %v1015_v13 = vpop.f32.mrf.mxu3  ;;  %v1068_v38 = vadd.f32 %v1067_v55, %v1066_v53  ;;  %v1039_v17 = vadd.f32 %v1038_v22, %v1037_v39 }
 0x183   : > { %1027 = vst.msk [vmem:[%s1839_s10 + $0x30] sm:$0xff] %vm797_vm9, %v1015_v13  ;;  %v1058_v3 = vmul.f32 %v1015_v13, %v1015_v13  ;;  %v1040_v43 = vsel %vm797_vm9, %v1015_v13, 0.0 }
 0x184   : > { %v1070_v2 = vadd.f32 %v1069_v28, %v1068_v38  ;;  %v1041_v11 = vadd.f32 %v1040_v43, %v1039_v17 }
 0x185   : > { %v1071_v15 = vsel %vm797_vm9, %v1058_v3, 0.0 }
 0x186   : > { %v1072_v52 = vadd.f32 %v1071_v15, %v1070_v2 }
 0x18a   : > { %v1017_v48 = vpop.f32.mrf.mxu3 }
 0x18b   : > { %1028 = vst.msk [vmem:[%s1839_s10 + $0x38] sm:$0xff] %vm797_vm9, %v1017_v48  ;;  %v1042_v16 = vsel %vm797_vm9, %v1017_v48, 0.0  ;;  %v1059_v0 = vmul.f32 %v1017_v48, %v1017_v48 }
 0x18c   : > { %v1043_v14 = vadd.f32 %v1042_v16, %v1041_v11 }
 0x18d   : > { %v1073_v36 = vsel %vm797_vm9, %v1059_v0, 0.0 }
 0x18e   : > { %v1044_v31 = vrot.slane %v1043_v14, 4  ;;  %v1074_v45 = vadd.f32 %v1073_v36, %v1072_v52 }
 0x190   : > { %v1045_v32 = vadd.f32 %v1044_v31, %v1043_v14  ;;  %v1075_v40 = vrot.slane %v1074_v45, 4 }
 0x192   : > { %v1046_v44 = vrot.slane %v1045_v32, 2  ;;  %v1076_v56 = vadd.f32 %v1075_v40, %v1074_v45 }
 0x194   : > { %v1047_v37 = vadd.f32 %v1046_v44, %v1045_v32  ;;  %v1077_v6 = vrot.slane %v1076_v56, 2 }
 0x196   : > { %v1048_v46 = vrot.slane %v1047_v37, 1  ;;  %v1078_v49 = vadd.f32 %v1077_v6, %v1076_v56 }
 0x198   : > { %v1049_v50 = vadd.f32 %v1048_v46, %v1047_v37  ;;  %v1079_v57 = vrot.slane %v1078_v49, 1 }
 0x19a   : > { %1051 = vst.msk [vmem:[%s315_s13] sm:$0x1] %vm1050_vm3, %v1049_v50  ;;  %v1080_v58 = vadd.f32 %v1079_v57, %v1078_v49 }
 0x19c   : > { %1081 = vst.msk [vmem:[%s321_s16] sm:$0x1] %vm1050_vm3, %v1080_v58 }
 0x19d PF: > { %s17_s23 = sadd.s32 1, %s1385_s23   ;;  %s1901_s21 = smov %s1381_s22 }
 0x19e   : > { %p14_p5 = scmp.ge.s32.totalorder %s17_s23, 4   ;;  %s1902_s22 = smov %s1904_s24 }
 0x1a0   :  { %16 = sbr.rel (!%p14_p5) target bundleno = 2 (0x2), region = 97 }

</bundles_post_ra>
